<compile_context>
chip_gen: v7x
topology: tpu7x:2x2x1
jax: 0.10.0
libtpu: 0.0.40
codegen_flags: <defaults>
</compile_context>

<pallas_src>
import functools
import math

import jax
import jax.numpy as jnp
from jax import lax
from jax.experimental import pallas as pl
from jax.experimental.pallas import tpu as pltpu

# ---- model hyper-parameters (consistent with the module's __init__) ----
PAD = 32
NUM_TOKENS = 64           # num_tokens
D_MODEL = 32              # dim_model
NUM_HEADS = 4             # num_heads
NUM_LAYERS = 2            # num_encoder_layers
FFN_DIM = 2048            # nn.TransformerEncoderLayer default dim_feedforward
MAX_LEN = 5000            # PositionalEncoding max_len
LN_EPS = 1e-5             # nn.LayerNorm default eps
HEAD_DIM = D_MODEL // NUM_HEADS

# packed small-vector operand: one sublane row per vector, lane-offset-0 slices
VEC_ROWS = 8              # rows: in_b, out_b, ln1_w, ln1_b, lin2_b, ln2_w, ln2_b, pad


# ---------------------------------------------------------------------------
# Math helpers — shared VERBATIM by the Pallas kernel body and the
# precision-matched JAX reference, so the two agree to float rounding.
# ---------------------------------------------------------------------------
def _layer_norm(y, w, b):
    mu = jnp.mean(y, axis=-1, keepdims=True)
    yc = y - mu
    var = jnp.mean(yc * yc, axis=-1, keepdims=True)
    return yc * lax.rsqrt(var + LN_EPS) * w + b


def _unpack_vecs(vecs, d_model):
    """Slice the packed (VEC_ROWS, 3D) per-layer vector operand (all slices are
    sublane-indexed, lane offset 0 — no lane shifts)."""
    in_b = vecs[0:1, :]
    out_b = vecs[1:2, :d_model]
    ln1_w = vecs[2:3, :d_model]
    ln1_b = vecs[3:4, :d_model]
    lin2_b = vecs[4:5, :d_model]
    ln2_w = vecs[5:6, :d_model]
    ln2_b = vecs[6:7, :d_model]
    return in_b, out_b, ln1_w, ln1_b, lin2_b, ln2_w, ln2_b


def _token_embed_math(ids, emb_table, pe):
    """Token gather (one-hot matmul — exact: each row selects one f32 table row)
    plus the batch-indexed positional add.  Returns row-flattened (B*S, D) f32."""
    B, S = ids.shape
    T, D = emb_table.shape
    tok = lax.broadcasted_iota(jnp.int32, (B, S, T), 2)
    one_hot = (ids[:, :, None] == tok).astype(jnp.float32)          # (B, S, T)
    emb = jnp.dot(one_hot.reshape(B * S, T), emb_table,
                  preferred_element_type=jnp.float32)                # (B*S, D)
    return (emb.reshape(B, S, D) + pe).reshape(B * S, D)


def _encoder_layer_math(x, in_wt, out_wt, lin1_wt, lin1_b, lin2_wt, vecs,
                        *, batch, seq, num_heads):
    """One post-norm nn.TransformerEncoderLayer (relu activation), x is (B*S, D) f32.
    bf16 MXU matmuls with f32 accumulation; LN / softmax / residual math in f32."""
    B, S, H = batch, seq, num_heads
    N, D = x.shape
    hd = D // H
    scale = 1.0 / math.sqrt(hd)
    bf16 = jnp.bfloat16

    in_b, out_b, ln1_w, ln1_b, lin2_b, ln2_w, ln2_b = _unpack_vecs(vecs, D)

    # ---- multi-head self-attention (head-batched: 4 MXU ops total) ----
    qkv = jnp.dot(x.astype(bf16), in_wt,
                  preferred_element_type=jnp.float32) + in_b         # (N, 3D)

    def split_heads(t):                                              # (N, D) -> (B*H, S, hd)
        t = t.reshape(B, S, H, hd)
        return jnp.transpose(t, (0, 2, 1, 3)).reshape(B * H, S, hd)

    q = split_heads(qkv[:, :D] * scale)
    k = split_heads(qkv[:, D:2 * D])
    v = split_heads(qkv[:, 2 * D:3 * D])

    s = jnp.einsum("bqd,bkd->bqk", q.astype(bf16), k.astype(bf16),
                   preferred_element_type=jnp.float32)               # (B*H, S, S)
    s = s - jnp.max(s, axis=-1, keepdims=True)
    p = jnp.exp(s)
    p = p / jnp.sum(p, axis=-1, keepdims=True)                       # exact softmax divide
    a = jnp.einsum("bqk,bkd->bqd", p.astype(bf16), v.astype(bf16),
                   preferred_element_type=jnp.float32)               # (B*H, S, hd)
    a = jnp.transpose(a.reshape(B, H, S, hd), (0, 2, 1, 3)).reshape(N, D)

    attn = jnp.dot(a.astype(bf16), out_wt,
                   preferred_element_type=jnp.float32) + out_b       # (N, D)

    x = _layer_norm(x + attn, ln1_w, ln1_b)

    # ---- feed-forward (the dominant FLOPs) ----
    h1 = jnp.dot(x.astype(bf16), lin1_wt,
                 preferred_element_type=jnp.float32) + lin1_b        # (N, F)
    h1 = jnp.maximum(h1, 0.0)
    h2 = jnp.dot(h1.astype(bf16), lin2_wt,
                 preferred_element_type=jnp.float32) + lin2_b        # (N, D)

    return _layer_norm(x + h2, ln2_w, ln2_b)


# ---------------------------------------------------------------------------
# The single fused kernel, iterated over a layer grid.
# ---------------------------------------------------------------------------
def _encoder_kernel(ids_ref, emb_ref, pe_ref,
                    in_wt_ref, out_wt_ref, lin1_wt_ref, lin1_b_ref, lin2_wt_ref,
                    vecs_ref, o_ref, x_scratch, *, num_heads):
    l = pl.program_id(0)
    B, S = ids_ref.shape
    D = emb_ref.shape[1]

    # Gather + batch-indexed PE add only on the first layer step; the activation is
    # carried across grid steps in VMEM scratch.
    @pl.when(l == 0)
    def _init():
        x_scratch[...] = _token_embed_math(ids_ref[...], emb_ref[...], pe_ref[...])

    x = _encoder_layer_math(
        x_scratch[...], in_wt_ref[...], out_wt_ref[...], lin1_wt_ref[...],
        lin1_b_ref[...], lin2_wt_ref[...], vecs_ref[...],
        batch=B, seq=S, num_heads=num_heads)
    x_scratch[...] = x

    # Output already in the module's (S, B, D) layout — removes the wrapper-side
    # transpose launch.  The out index_map is constant over the grid, so only the
    # final buffer content is written back to HBM.
    o_ref[...] = jnp.transpose(x.reshape(B, S, D), (1, 0, 2))


def fused_encoder(src, prepared):
    B, S = src.shape
    D, F, T, L, H, hd = D_MODEL, FFN_DIM, NUM_TOKENS, NUM_LAYERS, NUM_HEADS, HEAD_DIM

    flops = int(2 * B * S * T * D
                + L * (2 * B * S * (3 * D * D + D * D + 2 * D * F)
                       + 4 * B * H * S * S * hd))
    transcendentals = int(L * B * H * S * S + 2 * L * B * S)
    bytes_accessed = int(T * D * 4 + B * D * 4 + B * S * 4 + S * B * D * 4
                         + L * ((3 * D * D + D * D + 2 * D * F) * 2
                                + (F + VEC_ROWS * 3 * D) * 4))

    # TODO(synk): on v7x (2 TensorCores) a leading "parallel" batch-grid axis would
    # shard the two independent batch rows across cores; kept off here because on
    # v5e/v6e it only adds per-step overhead.
    return pl.pallas_call(
        functools.partial(_encoder_kernel, num_heads=H),
        out_shape=jax.ShapeDtypeStruct((S, B, D), jnp.float32),
        grid_spec=pltpu.PrefetchScalarGridSpec(
            num_scalar_prefetch=0,
            grid=(L,),
            in_specs=[
                pl.BlockSpec((B, S), lambda l: (0, 0)),                 # token ids
                pl.BlockSpec((T, D), lambda l: (0, 0)),                 # embedding table
                pl.BlockSpec((B, 1, D), lambda l: (0, 0, 0)),           # batch-indexed PE
                pl.BlockSpec((None, D, 3 * D), lambda l: (l, 0, 0)),    # in_proj W^T
                pl.BlockSpec((None, D, D), lambda l: (l, 0, 0)),        # out_proj W^T
                pl.BlockSpec((None, D, F), lambda l: (l, 0, 0)),        # FFN1 W^T
                pl.BlockSpec((None, 1, F), lambda l: (l, 0, 0)),        # FFN1 bias
                pl.BlockSpec((None, F, D), lambda l: (l, 0, 0)),        # FFN2 W^T
                pl.BlockSpec((None, VEC_ROWS, 3 * D), lambda l: (l, 0, 0)),  # packed vectors
            ],
            out_specs=pl.BlockSpec((S, B, D), lambda l: (0, 0, 0)),
            scratch_shapes=[pltpu.VMEM((B * S, D), jnp.float32)],       # activation carry
        ),
        compiler_params=pltpu.CompilerParams(dimension_semantics=("arbitrary",)),
        cost_estimate=pl.CostEstimate(flops=flops, transcendentals=transcendentals,
                                      bytes_accessed=bytes_accessed),
    )(src, prepared["emb"], prepared["pe_b"], prepared["in_wt"], prepared["out_wt"],
      prepared["lin1_wt"], prepared["lin1_b"], prepared["lin2_wt"], prepared["vecs"])


def transformer_encoder_forward(src, prepared):
    # The whole forward is ONE pallas_call (gather + PE + 2 encoder layers + output
    # permute); returns (S, B, D), the PyTorch output layout.
    return fused_encoder(src, prepared)


# ---------------------------------------------------------------------------
# Parameter / buffer construction (deterministic, synthetic) + offline prep
# ---------------------------------------------------------------------------
def build_pos_encoding(max_len, d):
    pos = jnp.arange(max_len, dtype=jnp.float32)[:, None]
    div = jnp.exp(jnp.arange(0, d, 2, dtype=jnp.float32) * (-math.log(10000.0) / d))
    pe = jnp.zeros((max_len, d), jnp.float32)
    pe = pe.at[:, 0::2].set(jnp.sin(pos * div))
    pe = pe.at[:, 1::2].set(jnp.cos(pos * div))
    return pe                                                        # (max_len, D)


def init_params(key):
    ks = jax.random.split(key, 1 + NUM_LAYERS)
    emb = jax.random.normal(ks[0], (NUM_TOKENS, D_MODEL), jnp.float32)
    layers = []
    for i in range(NUM_LAYERS):
        lk = jax.random.split(ks[1 + i], 4)
        D, F = D_MODEL, FFN_DIM
        layers.append(dict(
            in_w=0.05 * jax.random.normal(lk[0], (3 * D, D), jnp.float32),
            in_b=jnp.zeros((3 * D,), jnp.float32),
            out_w=0.05 * jax.random.normal(lk[1], (D, D), jnp.float32),
            out_b=jnp.zeros((D,), jnp.float32),
            ln1_w=jnp.ones((D,), jnp.float32),
            ln1_b=jnp.zeros((D,), jnp.float32),
            lin1_w=0.05 * jax.random.normal(lk[2], (F, D), jnp.float32),
            lin1_b=jnp.zeros((F,), jnp.float32),
            lin2_w=0.05 * jax.random.normal(lk[3], (D, F), jnp.float32),
            lin2_b=jnp.zeros((D,), jnp.float32),
            ln2_w=jnp.ones((D,), jnp.float32),
            ln2_b=jnp.zeros((D,), jnp.float32),
        ))
    return dict(embedding=emb, layers=layers)


def prepare_weights(params, pe_table, batch):
    """Offline prep: transpose to x @ W layout, stack layers on a leading axis, cast
    matmul weights to bf16, fold sqrt(d_model) into the embedding, pre-slice the
    batch-indexed PE, and pack the seven tiny per-layer f32 vectors into one operand."""
    D = D_MODEL
    bf16 = jnp.bfloat16
    layers = params["layers"]

    def stack(fn):
        return jnp.stack([fn(p) for p in layers])

    def pack_vecs(p):
        pad = 3 * D - D
        rows = [p["in_b"],                          # row 0: (3D,)
                jnp.pad(p["out_b"], (0, pad)),      # row 1
                jnp.pad(p["ln1_w"], (0, pad)),      # row 2
                jnp.pad(p["ln1_b"], (0, pad)),      # row 3
                jnp.pad(p["lin2_b"], (0, pad)),     # row 4
                jnp.pad(p["ln2_w"], (0, pad)),      # row 5
                jnp.pad(p["ln2_b"], (0, pad)),      # row 6
                jnp.zeros((3 * D,), jnp.float32)]   # row 7: padding
        return jnp.stack(rows)                      # (VEC_ROWS, 3D)

    return dict(
        emb=params["embedding"] * math.sqrt(D),               # fold sqrt(d_model), keep f32
        pe_b=pe_table[:batch][:, None, :],                    # (B, 1, D) batch-indexed PE (as in the module)
        in_wt=stack(lambda p: p["in_w"].T).astype(bf16),      # (L, D, 3D)
        out_wt=stack(lambda p: p["out_w"].T).astype(bf16),    # (L, D, D)
        lin1_wt=stack(lambda p: p["lin1_w"].T).astype(bf16),  # (L, D, F)
        lin1_b=stack(lambda p: p["lin1_b"].reshape(1, -1)),   # (L, 1, F) f32
        lin2_wt=stack(lambda p: p["lin2_w"].T).astype(bf16),  # (L, F, D)
        vecs=stack(pack_vecs),                                # (L, VEC_ROWS, 3D) f32
    )


# ---------------------------------------------------------------------------
# References
#   1) precision-matched: identical math helpers as the kernel (same bf16 recipe)
#   2) full-f32 module math: looser tolerance, the gap is bf16 weight/activation
#      rounding (bit-for-bit consistency is enforced by reference (1)).
# ---------------------------------------------------------------------------
def reference_forward_matched(src, prepared):
    B, S = src.shape
    D = D_MODEL
    x = _token_embed_math(src, prepared["emb"], prepared["pe_b"])
    for l in range(NUM_LAYERS):
        x = _encoder_layer_math(
            x, prepared["in_wt"][l], prepared["out_wt"][l], prepared["lin1_wt"][l],
            prepared["lin1_b"][l], prepared["lin2_wt"][l], prepared["vecs"][l],
            batch=B, seq=S, num_heads=NUM_HEADS)
    return jnp.transpose(x.reshape(B, S, D), (1, 0, 2))


def _ref_layer_f32(x, p):   # x: (B, S, D)
    D = x.shape[-1]
    H, hd = NUM_HEADS, D // NUM_HEADS
    qkv = jnp.einsum("bsd,ed->bse", x, p["in_w"]) + p["in_b"]
    q, k, v = qkv[..., :D], qkv[..., D:2 * D], qkv[..., 2 * D:]
    q = q.reshape(*q.shape[:2], H, hd) / math.sqrt(hd)
    k = k.reshape(*k.shape[:2], H, hd)
    v = v.reshape(*v.shape[:2], H, hd)
    s = jnp.einsum("bqhd,bkhd->bhqk", q, k)
    a = jnp.einsum("bhqk,bkhd->bqhd", jax.nn.softmax(s, axis=-1), v).reshape(x.shape)
    a = a @ p["out_w"].T + p["out_b"]

    def ln(y, w, b):
        mu = jnp.mean(y, axis=-1, keepdims=True)
        var = jnp.mean((y - mu) ** 2, axis=-1, keepdims=True)
        return (y - mu) / jnp.sqrt(var + LN_EPS) * w + b

    x = ln(x + a, p["ln1_w"], p["ln1_b"])
    h = jax.nn.relu(x @ p["lin1_w"].T + p["lin1_b"]) @ p["lin2_w"].T + p["lin2_b"]
    return ln(x + h, p["ln2_w"], p["ln2_b"])


def reference_forward_f32(src, params, pe_table):
    B = src.shape[0]
    x = params["embedding"][src] * math.sqrt(D_MODEL)
    x = x + pe_table[:B][:, None, :]          # batch-indexed PE, exactly as in the module
    for lp in params["layers"]:
        x = _ref_layer_f32(x, lp)
    return jnp.transpose(x, (1, 0, 2))


# ---------------------------------------------------------------------------
if __name__ == "__main__":
    root = jax.random.PRNGKey(0)
    key_params, key_data = jax.random.split(root)

    params = init_params(key_params)
    pe_table = build_pos_encoding(MAX_LEN, D_MODEL)

    B, S = 2, 8
    src = jax.random.randint(key_data, (B, S), 0, NUM_TOKENS, dtype=jnp.int32)
    prepared = prepare_weights(params, pe_table, batch=B)

    fwd = jax.jit(transformer_encoder_forward)
    out = jax.block_until_ready(fwd(src, prepared))
    assert out.shape == (S, B, D_MODEL), out.shape

    # (1) tight check vs a reference built from the SAME math helpers / precision recipe
    ref = reference_forward_matched(src, prepared)
    err = float(jnp.max(jnp.abs(out - ref)))
    assert err < 5e-3, f"mismatch vs precision-matched reference: {err}"

    # (2) loose check vs the full-f32 module math (gap = bf16 weight/activation rounding)
    ref32 = reference_forward_f32(src, params, pe_table)
    err32 = float(jnp.max(jnp.abs(out - ref32)))
    assert err32 < 2e-1, f"mismatch vs f32 reference: {err32}"

    print("KERNEL_OK")
</pallas_src>

<mosaic_0001>
module attributes {stable_mosaic.version = 11 : i64} {
  func.func @_encoder_kernel(%arg0: i32, %arg1: memref<2x8xi32, #tpu.memory_space<vmem>>, %arg2: memref<64x32xf32, #tpu.memory_space<vmem>>, %arg3: memref<2x1x32xf32, #tpu.memory_space<vmem>>, %arg4: memref<1x32x96xbf16, #tpu.memory_space<vmem>>, %arg5: memref<1x32x32xbf16, #tpu.memory_space<vmem>>, %arg6: memref<1x32x2048xbf16, #tpu.memory_space<vmem>>, %arg7: memref<1x1x2048xf32, #tpu.memory_space<vmem>>, %arg8: memref<1x2048x32xbf16, #tpu.memory_space<vmem>>, %arg9: memref<1x8x96xf32, #tpu.memory_space<vmem>>, %arg10: memref<8x2x32xf32, #tpu.memory_space<vmem>>, %arg11: memref<16x32xf32, #tpu.memory_space<vmem>>) attributes {dimension_semantics = [#tpu.dimension_semantics<arbitrary>], iteration_bounds = array<i64: 2>, scalar_prefetch = 0 : i64, scratch_operands = 1 : i64, tpu.core_type = #tpu.core_type<tc>, window_params = [{pipeline_mode = #tpu.pipeline_mode<synchronous>, transform_indices = @transform_0, window_bounds = array<i64: 2, 8>}, {pipeline_mode = #tpu.pipeline_mode<synchronous>, transform_indices = @transform_1, window_bounds = array<i64: 64, 32>}, {pipeline_mode = #tpu.pipeline_mode<synchronous>, transform_indices = @transform_2, window_bounds = array<i64: 2, 1, 32>}, {transform_indices = @transform_3, window_bounds = array<i64: 1, 32, 96>}, {transform_indices = @transform_4, window_bounds = array<i64: 1, 32, 32>}, {transform_indices = @transform_5, window_bounds = array<i64: 1, 32, 2048>}, {transform_indices = @transform_6, window_bounds = array<i64: 1, 1, 2048>}, {transform_indices = @transform_7, window_bounds = array<i64: 1, 2048, 32>}, {transform_indices = @transform_8, window_bounds = array<i64: 1, 8, 96>}, {pipeline_mode = #tpu.pipeline_mode<synchronous>, transform_indices = @transform_9, window_bounds = array<i64: 8, 2, 32>}]} {
    %c0_i32 = arith.constant 0 : i32
    %0 = arith.cmpi eq, %arg0, %c0_i32 : i32
    %1 = arith.extui %0 : i1 to i32
    %c0_i32_0 = arith.constant 0 : i32
    %2 = arith.cmpi ne, %1, %c0_i32_0 : i32
    scf.if %2 {
      %c0_44 = arith.constant 0 : index
      %c0_45 = arith.constant 0 : index
      %119 = vector.load %arg1[%c0_44, %c0_45] : memref<2x8xi32, #tpu.memory_space<vmem>>, vector<2x8xi32>
      %c0_46 = arith.constant 0 : index
      %c0_47 = arith.constant 0 : index
      %120 = vector.load %arg2[%c0_46, %c0_47] : memref<64x32xf32, #tpu.memory_space<vmem>>, vector<64x32xf32>
      %c0_48 = arith.constant 0 : index
      %c0_49 = arith.constant 0 : index
      %c0_50 = arith.constant 0 : index
      %121 = vector.load %arg3[%c0_48, %c0_49, %c0_50] : memref<2x1x32xf32, #tpu.memory_space<vmem>>, vector<2x1x32xf32>
      %122 = tpu.iota {dimensions = array<i32: 2>} : vector<2x8x64xi32>
      %123 = vector.shape_cast %119 : vector<2x8xi32> to vector<2x8x1xi32>
      %124 = vector.broadcast %123 : vector<2x8x1xi32> to vector<2x8x64xi32>
      %125 = arith.cmpi eq, %124, %122 : vector<2x8x64xi32>
      %126 = arith.extui %125 : vector<2x8x64xi1> to vector<2x8x64xi32>
      %127 = arith.sitofp %126 : vector<2x8x64xi32> to vector<2x8x64xf32>
      %128 = vector.shape_cast %127 : vector<2x8x64xf32> to vector<16x64xf32>
      %cst_51 = arith.constant dense<0.000000e+00> : vector<16x32xf32>
      %129 = tpu.matmul %128, %120, %cst_51 {dimension_numbers = #tpu.dot_dimension_numbers<[1], [0], [0], [1], [0, 0, 1, 1], [], []>} : vector<16x64xf32>, vector<64x32xf32>, vector<16x32xf32> -> vector<16x32xf32>
      %130 = vector.shape_cast %129 : vector<16x32xf32> to vector<2x8x32xf32>
      %131 = vector.broadcast %121 : vector<2x1x32xf32> to vector<2x8x32xf32>
      %132 = arith.addf %130, %131 : vector<2x8x32xf32>
      %133 = vector.shape_cast %132 : vector<2x8x32xf32> to vector<16x32xf32>
      %c0_52 = arith.constant 0 : index
      %c0_53 = arith.constant 0 : index
      %134 = vector.load %arg11[%c0_52, %c0_53] : memref<16x32xf32, #tpu.memory_space<vmem>>, vector<16x32xf32>
      tpu.vector_store %arg11[%c0_52, %c0_53], %133 {strides = array<i32>} : memref<16x32xf32, #tpu.memory_space<vmem>>, vector<16x32xf32>,
    } else {
    }
    %c0 = arith.constant 0 : index
    %c0_1 = arith.constant 0 : index
    %3 = vector.load %arg11[%c0, %c0_1] : memref<16x32xf32, #tpu.memory_space<vmem>>, vector<16x32xf32>
    %c0_2 = arith.constant 0 : index
    %c0_3 = arith.constant 0 : index
    %c0_4 = arith.constant 0 : index
    %4 = vector.load %arg4[%c0_2, %c0_3, %c0_4] : memref<1x32x96xbf16, #tpu.memory_space<vmem>>, vector<1x32x96xbf16>
    %5 = vector.shape_cast %4 : vector<1x32x96xbf16> to vector<32x96xbf16>
    %c0_5 = arith.constant 0 : index
    %c0_6 = arith.constant 0 : index
    %c0_7 = arith.constant 0 : index
    %6 = vector.load %arg5[%c0_5, %c0_6, %c0_7] : memref<1x32x32xbf16, #tpu.memory_space<vmem>>, vector<1x32x32xbf16>
    %7 = vector.shape_cast %6 : vector<1x32x32xbf16> to vector<32x32xbf16>
    %c0_8 = arith.constant 0 : index
    %c0_9 = arith.constant 0 : index
    %c0_10 = arith.constant 0 : index
    %8 = vector.load %arg6[%c0_8, %c0_9, %c0_10] : memref<1x32x2048xbf16, #tpu.memory_space<vmem>>, vector<1x32x2048xbf16>
    %9 = vector.shape_cast %8 : vector<1x32x2048xbf16> to vector<32x2048xbf16>
    %c0_11 = arith.constant 0 : index
    %c0_12 = arith.constant 0 : index
    %c0_13 = arith.constant 0 : index
    %10 = vector.load %arg7[%c0_11, %c0_12, %c0_13] : memref<1x1x2048xf32, #tpu.memory_space<vmem>>, vector<1x1x2048xf32>
    %11 = vector.shape_cast %10 : vector<1x1x2048xf32> to vector<1x2048xf32>
    %c0_14 = arith.constant 0 : index
    %c0_15 = arith.constant 0 : index
    %c0_16 = arith.constant 0 : index
    %12 = vector.load %arg8[%c0_14, %c0_15, %c0_16] : memref<1x2048x32xbf16, #tpu.memory_space<vmem>>, vector<1x2048x32xbf16>
    %13 = vector.shape_cast %12 : vector<1x2048x32xbf16> to vector<2048x32xbf16>
    %c0_17 = arith.constant 0 : index
    %c0_18 = arith.constant 0 : index
    %c0_19 = arith.constant 0 : index
    %14 = vector.load %arg9[%c0_17, %c0_18, %c0_19] : memref<1x8x96xf32, #tpu.memory_space<vmem>>, vector<1x8x96xf32>
    %15 = vector.shape_cast %14 : vector<1x8x96xf32> to vector<8x96xf32>
    %16 = vector.extract_strided_slice %15 {offsets = [0, 0], sizes = [1, 96], strides = [1, 1]} : vector<8x96xf32> to vector<1x96xf32>
    %17 = vector.extract_strided_slice %15 {offsets = [1, 0], sizes = [1, 32], strides = [1, 1]} : vector<8x96xf32> to vector<1x32xf32>
    %18 = vector.extract_strided_slice %15 {offsets = [2, 0], sizes = [1, 32], strides = [1, 1]} : vector<8x96xf32> to vector<1x32xf32>
    %19 = vector.extract_strided_slice %15 {offsets = [3, 0], sizes = [1, 32], strides = [1, 1]} : vector<8x96xf32> to vector<1x32xf32>
    %20 = vector.extract_strided_slice %15 {offsets = [4, 0], sizes = [1, 32], strides = [1, 1]} : vector<8x96xf32> to vector<1x32xf32>
    %21 = vector.extract_strided_slice %15 {offsets = [5, 0], sizes = [1, 32], strides = [1, 1]} : vector<8x96xf32> to vector<1x32xf32>
    %22 = vector.extract_strided_slice %15 {offsets = [6, 0], sizes = [1, 32], strides = [1, 1]} : vector<8x96xf32> to vector<1x32xf32>
    %23 = arith.truncf %3 : vector<16x32xf32> to vector<16x32xbf16>
    %cst = arith.constant dense<0.000000e+00> : vector<16x96xf32>
    %24 = tpu.matmul %23, %5, %cst {dimension_numbers = #tpu.dot_dimension_numbers<[1], [0], [0], [1], [0, 0, 1, 1], [], []>} : vector<16x32xbf16>, vector<32x96xbf16>, vector<16x96xf32> -> vector<16x96xf32>
    %25 = vector.broadcast %16 : vector<1x96xf32> to vector<16x96xf32>
    %26 = arith.addf %24, %25 : vector<16x96xf32>
    %27 = vector.extract_strided_slice %26 {offsets = [0, 0], sizes = [16, 32], strides = [1, 1]} : vector<16x96xf32> to vector<16x32xf32>
    %cst_20 = arith.constant 0.353553385 : f32
    %28 = vector.broadcast %cst_20 : f32 to vector<16x32xf32>
    %29 = arith.mulf %27, %28 : vector<16x32xf32>
    %30 = vector.shape_cast %29 : vector<16x32xf32> to vector<2x8x4x8xf32>
    %31 = tpu.transpose %30, [0, 2, 1, 3] : vector<2x8x4x8xf32> -> vector<2x4x8x8xf32>
    %32 = vector.shape_cast %31 : vector<2x4x8x8xf32> to vector<8x8x8xf32>
    %33 = vector.extract_strided_slice %26 {offsets = [0, 32], sizes = [16, 32], strides = [1, 1]} : vector<16x96xf32> to vector<16x32xf32>
    %34 = vector.shape_cast %33 : vector<16x32xf32> to vector<2x8x4x8xf32>
    %35 = tpu.transpose %34, [0, 2, 1, 3] : vector<2x8x4x8xf32> -> vector<2x4x8x8xf32>
    %36 = vector.shape_cast %35 : vector<2x4x8x8xf32> to vector<8x8x8xf32>
    %37 = vector.extract_strided_slice %26 {offsets = [0, 64], sizes = [16, 32], strides = [1, 1]} : vector<16x96xf32> to vector<16x32xf32>
    %38 = vector.shape_cast %37 : vector<16x32xf32> to vector<2x8x4x8xf32>
    %39 = tpu.transpose %38, [0, 2, 1, 3] : vector<2x8x4x8xf32> -> vector<2x4x8x8xf32>
    %40 = vector.shape_cast %39 : vector<2x4x8x8xf32> to vector<8x8x8xf32>
    %41 = arith.truncf %32 : vector<8x8x8xf32> to vector<8x8x8xbf16>
    %42 = arith.truncf %36 : vector<8x8x8xf32> to vector<8x8x8xbf16>
    "tpu.trace_start"() <{level = 10 : i32, message = "bqd,bkd->bqk"}> : () -> ()
    %cst_21 = arith.constant dense<0.000000e+00> : vector<8x8x8xf32>
    %43 = tpu.matmul %41, %42, %cst_21 {dimension_numbers = #tpu.dot_dimension_numbers<[2], [2], [1], [1], [0, 0, 0, 1, 1, 1], [0], [0]>} : vector<8x8x8xbf16>, vector<8x8x8xbf16>, vector<8x8x8xf32> -> vector<8x8x8xf32>
    "tpu.trace_stop"() : () -> ()
    %cst_22 = arith.constant dense<0xFF800000> : vector<8x8xf32>
    %44 = vector.multi_reduction <maximumf>, %43, %cst_22 [2] : vector<8x8x8xf32> to vector<8x8xf32>
    %45 = vector.shape_cast %44 : vector<8x8xf32> to vector<8x8x1xf32>
    %46 = vector.broadcast %45 : vector<8x8x1xf32> to vector<8x8x8xf32>
    %47 = arith.subf %43, %46 : vector<8x8x8xf32>
    %48 = math.exp %47 : vector<8x8x8xf32>
    %cst_23 = arith.constant dense<0.000000e+00> : vector<8x8xf32>
    %49 = vector.multi_reduction <add>, %48, %cst_23 [2] : vector<8x8x8xf32> to vector<8x8xf32>
    %50 = vector.shape_cast %49 : vector<8x8xf32> to vector<8x8x1xf32>
    %51 = vector.broadcast %50 : vector<8x8x1xf32> to vector<8x8x8xf32>
    %52 = arith.divf %48, %51 : vector<8x8x8xf32>
    %53 = arith.truncf %52 : vector<8x8x8xf32> to vector<8x8x8xbf16>
    %54 = arith.truncf %40 : vector<8x8x8xf32> to vector<8x8x8xbf16>
    "tpu.trace_start"() <{level = 10 : i32, message = "bqk,bkd->bqd"}> : () -> ()
    %cst_24 = arith.constant dense<0.000000e+00> : vector<8x8x8xf32>
    %55 = tpu.matmul %53, %54, %cst_24 {dimension_numbers = #tpu.dot_dimension_numbers<[2], [1], [1], [2], [0, 0, 0, 1, 1, 2], [0], [0]>} : vector<8x8x8xbf16>, vector<8x8x8xbf16>, vector<8x8x8xf32> -> vector<8x8x8xf32>
    "tpu.trace_stop"() : () -> ()
    %56 = vector.shape_cast %55 : vector<8x8x8xf32> to vector<2x4x8x8xf32>
    %57 = tpu.transpose %56, [0, 2, 1, 3] : vector<2x4x8x8xf32> -> vector<2x8x4x8xf32>
    %58 = vector.shape_cast %57 : vector<2x8x4x8xf32> to vector<16x32xf32>
    %59 = arith.truncf %58 : vector<16x32xf32> to vector<16x32xbf16>
    %cst_25 = arith.constant dense<0.000000e+00> : vector<16x32xf32>
    %60 = tpu.matmul %59, %7, %cst_25 {dimension_numbers = #tpu.dot_dimension_numbers<[1], [0], [0], [1], [0, 0, 1, 1], [], []>} : vector<16x32xbf16>, vector<32x32xbf16>, vector<16x32xf32> -> vector<16x32xf32>
    %61 = vector.broadcast %17 : vector<1x32xf32> to vector<16x32xf32>
    %62 = arith.addf %60, %61 : vector<16x32xf32>
    %63 = arith.addf %3, %62 : vector<16x32xf32>
    %cst_26 = arith.constant dense<0.000000e+00> : vector<16xf32>
    %64 = vector.multi_reduction <add>, %63, %cst_26 [1] : vector<16x32xf32> to vector<16xf32>
    %65 = vector.shape_cast %64 : vector<16xf32> to vector<16x1xf32>
    %cst_27 = arith.constant 3.200000e+01 : f32
    %66 = vector.broadcast %cst_27 : f32 to vector<16x1xf32>
    %67 = arith.divf %65, %66 : vector<16x1xf32>
    %68 = vector.broadcast %67 : vector<16x1xf32> to vector<16x32xf32>
    %69 = arith.subf %63, %68 : vector<16x32xf32>
    %70 = arith.mulf %69, %69 : vector<16x32xf32>
    %cst_28 = arith.constant dense<0.000000e+00> : vector<16xf32>
    %71 = vector.multi_reduction <add>, %70, %cst_28 [1] : vector<16x32xf32> to vector<16xf32>
    %72 = vector.shape_cast %71 : vector<16xf32> to vector<16x1xf32>
    %cst_29 = arith.constant 3.200000e+01 : f32
    %73 = vector.broadcast %cst_29 : f32 to vector<16x1xf32>
    %74 = arith.divf %72, %73 : vector<16x1xf32>
    %cst_30 = arith.constant 9.99999974E-6 : f32
    %75 = vector.broadcast %cst_30 : f32 to vector<16x1xf32>
    %76 = arith.addf %74, %75 : vector<16x1xf32>
    %77 = math.rsqrt %76 : vector<16x1xf32>
    %78 = vector.broadcast %77 : vector<16x1xf32> to vector<16x32xf32>
    %79 = arith.mulf %69, %78 : vector<16x32xf32>
    %80 = vector.broadcast %18 : vector<1x32xf32> to vector<16x32xf32>
    %81 = arith.mulf %79, %80 : vector<16x32xf32>
    %82 = vector.broadcast %19 : vector<1x32xf32> to vector<16x32xf32>
    %83 = arith.addf %81, %82 : vector<16x32xf32>
    %84 = arith.truncf %83 : vector<16x32xf32> to vector<16x32xbf16>
    %cst_31 = arith.constant dense<0.000000e+00> : vector<16x2048xf32>
    %85 = tpu.matmul %84, %9, %cst_31 {dimension_numbers = #tpu.dot_dimension_numbers<[1], [0], [0], [1], [0, 0, 1, 1], [], []>} : vector<16x32xbf16>, vector<32x2048xbf16>, vector<16x2048xf32> -> vector<16x2048xf32>
    %86 = vector.broadcast %11 : vector<1x2048xf32> to vector<16x2048xf32>
    %87 = arith.addf %85, %86 : vector<16x2048xf32>
    %cst_32 = arith.constant 0.000000e+00 : f32
    %88 = vector.broadcast %cst_32 : f32 to vector<16x2048xf32>
    %89 = arith.maximumf %87, %88 : vector<16x2048xf32>
    %90 = arith.truncf %89 : vector<16x2048xf32> to vector<16x2048xbf16>
    %cst_33 = arith.constant dense<0.000000e+00> : vector<16x32xf32>
    %91 = tpu.matmul %90, %13, %cst_33 {dimension_numbers = #tpu.dot_dimension_numbers<[1], [0], [0], [1], [0, 0, 1, 1], [], []>} : vector<16x2048xbf16>, vector<2048x32xbf16>, vector<16x32xf32> -> vector<16x32xf32>
    %92 = vector.broadcast %20 : vector<1x32xf32> to vector<16x32xf32>
    %93 = arith.addf %91, %92 : vector<16x32xf32>
    %94 = arith.addf %83, %93 : vector<16x32xf32>
    %cst_34 = arith.constant dense<0.000000e+00> : vector<16xf32>
    %95 = vector.multi_reduction <add>, %94, %cst_34 [1] : vector<16x32xf32> to vector<16xf32>
    %96 = vector.shape_cast %95 : vector<16xf32> to vector<16x1xf32>
    %cst_35 = arith.constant 3.200000e+01 : f32
    %97 = vector.broadcast %cst_35 : f32 to vector<16x1xf32>
    %98 = arith.divf %96, %97 : vector<16x1xf32>
    %99 = vector.broadcast %98 : vector<16x1xf32> to vector<16x32xf32>
    %100 = arith.subf %94, %99 : vector<16x32xf32>
    %101 = arith.mulf %100, %100 : vector<16x32xf32>
    %cst_36 = arith.constant dense<0.000000e+00> : vector<16xf32>
    %102 = vector.multi_reduction <add>, %101, %cst_36 [1] : vector<16x32xf32> to vector<16xf32>
    %103 = vector.shape_cast %102 : vector<16xf32> to vector<16x1xf32>
    %cst_37 = arith.constant 3.200000e+01 : f32
    %104 = vector.broadcast %cst_37 : f32 to vector<16x1xf32>
    %105 = arith.divf %103, %104 : vector<16x1xf32>
    %cst_38 = arith.constant 9.99999974E-6 : f32
    %106 = vector.broadcast %cst_38 : f32 to vector<16x1xf32>
    %107 = arith.addf %105, %106 : vector<16x1xf32>
    %108 = math.rsqrt %107 : vector<16x1xf32>
    %109 = vector.broadcast %108 : vector<16x1xf32> to vector<16x32xf32>
    %110 = arith.mulf %100, %109 : vector<16x32xf32>
    %111 = vector.broadcast %21 : vector<1x32xf32> to vector<16x32xf32>
    %112 = arith.mulf %110, %111 : vector<16x32xf32>
    %113 = vector.broadcast %22 : vector<1x32xf32> to vector<16x32xf32>
    %114 = arith.addf %112, %113 : vector<16x32xf32>
    %c0_39 = arith.constant 0 : index
    %c0_40 = arith.constant 0 : index
    %115 = vector.load %arg11[%c0_39, %c0_40] : memref<16x32xf32, #tpu.memory_space<vmem>>, vector<16x32xf32>
    tpu.vector_store %arg11[%c0_39, %c0_40], %114 {strides = array<i32>} : memref<16x32xf32, #tpu.memory_space<vmem>>, vector<16x32xf32>,
    %116 = vector.shape_cast %114 : vector<16x32xf32> to vector<2x8x32xf32>
    %117 = tpu.transpose %116, [1, 0, 2] : vector<2x8x32xf32> -> vector<8x2x32xf32>
    %c0_41 = arith.constant 0 : index
    %c0_42 = arith.constant 0 : index
    %c0_43 = arith.constant 0 : index
    %118 = vector.load %arg10[%c0_41, %c0_42, %c0_43] : memref<8x2x32xf32, #tpu.memory_space<vmem>>, vector<8x2x32xf32>
    tpu.vector_store %arg10[%c0_41, %c0_42, %c0_43], %117 {strides = array<i32>} : memref<8x2x32xf32, #tpu.memory_space<vmem>>, vector<8x2x32xf32>,
    return
  }
  func.func @transform_0(%arg0: i32) -> (i32, i32) {
    %c0_i32 = arith.constant 0 : i32
    %c0_i32_0 = arith.constant 0 : i32
    %c0_i32_1 = arith.constant 0 : i32
    return %c0_i32, %c0_i32_0 : i32, i32
  }
  func.func @transform_1(%arg0: i32) -> (i32, i32) {
    %c0_i32 = arith.constant 0 : i32
    %c0_i32_0 = arith.constant 0 : i32
    %c0_i32_1 = arith.constant 0 : i32
    return %c0_i32, %c0_i32_0 : i32, i32
  }
  func.func @transform_2(%arg0: i32) -> (i32, i32, i32) {
    %c0_i32 = arith.constant 0 : i32
    %c0_i32_0 = arith.constant 0 : i32
    %c0_i32_1 = arith.constant 0 : i32
    %c0_i32_2 = arith.constant 0 : i32
    return %c0_i32, %c0_i32_0, %c0_i32_1 : i32, i32, i32
  }
  func.func @transform_3(%arg0: i32) -> (i32, i32, i32) {
    %c0_i32 = arith.constant 0 : i32
    %c0_i32_0 = arith.constant 0 : i32
    %c0_i32_1 = arith.constant 0 : i32
    return %arg0, %c0_i32, %c0_i32_0 : i32, i32, i32
  }
  func.func @transform_4(%arg0: i32) -> (i32, i32, i32) {
    %c0_i32 = arith.constant 0 : i32
    %c0_i32_0 = arith.constant 0 : i32
    %c0_i32_1 = arith.constant 0 : i32
    return %arg0, %c0_i32, %c0_i32_0 : i32, i32, i32
  }
  func.func @transform_5(%arg0: i32) -> (i32, i32, i32) {
    %c0_i32 = arith.constant 0 : i32
    %c0_i32_0 = arith.constant 0 : i32
    %c0_i32_1 = arith.constant 0 : i32
    return %arg0, %c0_i32, %c0_i32_0 : i32, i32, i32
  }
  func.func @transform_6(%arg0: i32) -> (i32, i32, i32) {
    %c0_i32 = arith.constant 0 : i32
    %c0_i32_0 = arith.constant 0 : i32
    %c0_i32_1 = arith.constant 0 : i32
    return %arg0, %c0_i32, %c0_i32_0 : i32, i32, i32
  }
  func.func @transform_7(%arg0: i32) -> (i32, i32, i32) {
    %c0_i32 = arith.constant 0 : i32
    %c0_i32_0 = arith.constant 0 : i32
    %c0_i32_1 = arith.constant 0 : i32
    return %arg0, %c0_i32, %c0_i32_0 : i32, i32, i32
  }
  func.func @transform_8(%arg0: i32) -> (i32, i32, i32) {
    %c0_i32 = arith.constant 0 : i32
    %c0_i32_0 = arith.constant 0 : i32
    %c0_i32_1 = arith.constant 0 : i32
    return %arg0, %c0_i32, %c0_i32_0 : i32, i32, i32
  }
  func.func @transform_9(%arg0: i32) -> (i32, i32, i32) {
    %c0_i32 = arith.constant 0 : i32
    %c0_i32_0 = arith.constant 0 : i32
    %c0_i32_1 = arith.constant 0 : i32
    %c0_i32_2 = arith.constant 0 : i32
    return %c0_i32, %c0_i32_0, %c0_i32_1 : i32, i32, i32
  }
}

</mosaic_0001>

<bundles_post_ra>
// kernel: transformer_encoder_forward.1
= control target key start
LH: loop header
LB: loop body
LE: loop exit
PB: predicated region body
PF: predicated region fallthrough
CT: control target
= control target key end

     0   :  { %14 = vsyncpa [#allocation4], 0  ;;  %s5973_s30 = smov 0   ;;  %s6818_s0 = inlined_call_operand.vmem [shape: s32[2,8], index: 0, kind: input, shape index: {}]   ;;  %s6819_s1 = inlined_call_operand.vmem [shape: f32[64,32], index: 1, kind: input, shape index: {}]   ;;  %s6820_s2 = inlined_call_operand.vmem [shape: f32[2,1,32], index: 2, kind: input, shape index: {}]   ;;  %s6821_s3 = inlined_call_operand.vmem [shape: bf16[2,32,96], index: 3, kind: input, shape index: {}]   ;;  %s6822_s4 = inlined_call_operand.vmem [shape: bf16[2,32,32], index: 4, kind: input, shape index: {}]   ;;  %s6823_s5 = inlined_call_operand.vmem [shape: bf16[2,32,2048], index: 5, kind: input, shape index: {}]   ;;  %s6824_s6 = inlined_call_operand.vmem [shape: f32[2,1,2048], index: 6, kind: input, shape index: {}]   ;;  %s6825_s7 = inlined_call_operand.vmem [shape: bf16[2,2048,32], index: 7, kind: input, shape index: {}]   ;;  %s6826_s8 = inlined_call_operand.vmem [shape: f32[2,8,96], index: 8, kind: input, shape index: {}]   ;;  %s6827_s9 = inlined_call_operand.hbm [shape: f32[8,2,32], index: 9, kind: output, shape index: {}]  }
   0x1 LB: > { %s5979_s10 = sadd.s32 4294967295, %s5904_s30   ;;  %p5043_p0 = scmp.ge.s32.totalorder %s5904_s30, 1  ;;  %s5904_s30 = sphi %s5973_s30, %s20_s30  }
   0x2   : > { %p331_p1 = scmp.lt.s32.totalorder %s5904_s30, 3 }
   0x4   : > { %p332_p2 = pnand %p5043_p0, %p331_p1 }
   0x5   : > { %p385_p3 = scmp.lt.s32.totalorder (!%p332_p2), %s5979_s10, 1  ;;  %p5054_p4 = scmp.ne.s32.totalorder (!%p332_p2), %s5979_s10, 0 }
   0x6   : > { %335 = sbr.rel (%p332_p2) target bundleno = 3224 (0xc98), region = 56 }
   0xd   : > { %s386_s11 = scalar_select %p385_p3, %s5979_s10, 1 }
   0xe   : > { %417 = sbr.rel (%p5054_p4) target bundleno = 359 (0x167), region = 60  ;;  %v429_v0 = vlaneseq (!%p5054_p4)  ;;  %v419_v1 = vld [vmem:[%s6819_s1] sm:$0xff] (!%p5054_p4)  ;;  %v420_v2 = vld [vmem:[%s6819_s1 + $0x8] sm:$0xff] (!%p5054_p4)  ;;  %v421_v4 = vld [vmem:[%s6819_s1 + $0x10] sm:$0xff] (!%p5054_p4)  ;;  %vm451_vm0 = vcmask (!%p5054_p4), 523264   ;;  %v5906_v21 = vmov (!%p5054_p4), 0.0  }
   0xf   : > { %s5271_s12 = sshll.u32 %s386_s11, 4  ;;  %s5273_s13 = sshll.u32 %s386_s11, 8  ;;  %v5630_v3 = vpack.c.bf16 (!%p5054_p4), %v420_v2, %v419_v1  ;;  %v422_v5 = vld [vmem:[%s6819_s1 + $0x18] sm:$0xff] (!%p5054_p4)  ;;  %v423_v8 = vld [vmem:[%s6819_s1 + $0x20] sm:$0xff] (!%p5054_p4)  ;;  %v424_v9 = vld [vmem:[%s6819_s1 + $0x28] sm:$0xff] (!%p5054_p4)  ;;  %vm547_vm3 = vcmask (!%p5054_p4), 261120  }
  0x10   : > { %s5988_s16 = scalar_lea.vmem %s6821_s3, %s5271_s12  ;;  %s5993_s19 = scalar_lea.vmem %s6822_s4, %s5271_s12  ;;  %v432_v6 = vshrl.u32 (!%p5054_p4), %v429_v0, 7  ;;  %v5634_v7 = vpack.c.bf16 (!%p5054_p4), %v422_v5, %v421_v4  ;;  %v418_v10 = vld [vmem:[%s6818_s0] sm:$0x3] (!%p5054_p4)  ;;  %v5638_v13 = vpack.c.bf16 (!%p5054_p4), %v424_v9, %v423_v8  ;;  %v425_v15 = vld [vmem:[%s6819_s1 + $0x30] sm:$0xff] (!%p5054_p4)  ;;  %v426_v16 = vld [vmem:[%s6819_s1 + $0x38] sm:$0xff] (!%p5054_p4)  ;;  %v430_v19 = vand.u32 (!%p5054_p4), 127, %v429_v0 }
  0x11   : > { %s5998_s22 = scalar_lea.vmem %s6823_s5, %s5273_s13  ;;  %s6003_s25 = scalar_lea.vmem %s6824_s6, %s5271_s12  ;;  %5631 = vmatprep.subr.bf16.mxu0 (!%p5054_p4), %v5630_v3  ;;  %v5642_v18 = vpack.c.bf16 (!%p5054_p4), %v426_v16, %v425_v15  ;;  %v5060_v25 = vld [vmem:[%s6820_s2 + $0x1] ss:$0 sm:$0xff] (!%p5054_p4)  ;;  %v5059_v26 = vld [vmem:[%s6820_s2] ss:$0 sm:$0xff] (!%p5054_p4) }
  0x12   : > { %s5274_s26 = sshll.u32 %s386_s11, 10  ;;  %s5053_s27 = sshll.u32 %s386_s11, 3  ;;  %v433_v11 = vsub.s32 (!%p5054_p4), 0, %v432_v6  ;;  %v440_v12 = vsub.s32 (!%p5054_p4), 1, %v432_v6  ;;  %5633 = vmatpush3.bf16.msra.mxu0 (!%p5054_p4), %v5630_v3 }
  0x13   : > { %s6008_s14 = scalar_lea.vmem %s6825_s7, %s5274_s26  ;;  %s6013_s18 = scalar_lea.vmem %s6826_s8, %s5053_s27  ;;  %5635 = vmatprep.subr.bf16.mxu0 (!%p5054_p4), %v5634_v7 }
  0x14   : > { %v434_v14 = vrot.slane (!%p5054_p4), %v418_v10, %v433_v11  ;;  %v441_v17 = vrot.slane (!%p5054_p4), %v418_v10, %v440_v12 }
  0x16   : > { %436 = vbcast.lane.b32.xlu0 %v434_v14, 256  ;;  %5637 = vmatpush3.bf16.msra.mxu0 %v5634_v7 }
  0x17   : > { %5639 = vmatprep.subr.bf16.mxu0 %v5638_v13 }
  0x1a   : > { %443 = vbcast.lane.b32.xlu0 %v441_v17, 256  ;;  %5641 = vmatpush3.bf16.msra.mxu0 %v5638_v13 }
  0x1b   : > { %5643 = vmatprep.subr.bf16.mxu0 %v5642_v18 }
  0x1e   : > { %5645 = vmatpush3.bf16.msra.mxu0 %v5642_v18 }
  0x88   : > { %v437_v20 = vpop.permute.xlu0 %436 }
  0x89   : > { %vm445_vm1 = vcmp.eq.s32.totalorder %v437_v20, %v430_v19 }
  0x8a   : > { %v5055_v22 = vsel %vm445_vm1, 1.0, %v5906_v21 }
  0x8b   : > { %5515 = vmatprep.mubr.msk.f32.mxu0 %vm451_vm0, %v5055_v22 }
  0x8c   : > { %v444_v23 = vpop.permute.xlu0 %443 }
  0x8d   : > { %vm446_vm2 = vcmp.eq.s32.totalorder %v444_v23, %v430_v19 }
  0x8e   : > { %v5056_v24 = vsel %vm446_vm2, 1.0, %v5906_v21 }
  0x8f   : > { %5516 = vmatmul.mubr.msk.f32.vlgmr.msra.gmra.mrb[0].mxu0 %vm451_vm0, %v5056_v24 }
 0x162   : > { %v5517_v27 = vpop.f32.mrb[0].mxu0 }
 0x163   : > { %v546_v28 = vadd.f32 %v5517_v27, %v5060_v25  ;;  %v524_v29 = vpop.f32.mrb[1].mxu0 }
 0x164   : > { %v545_v30 = vadd.f32 %v5059_v26, %v524_v29 }
 0x165   : > { %549 = vst.msk [vmem:[#allocation2 + $0x8] sm:$0xff] %vm547_vm3, %v546_v28 }
 0x166   : > { %548 = vst.msk [vmem:[#allocation2] sm:$0xff] %vm547_vm3, %v545_v30 }
 0x167 PF: > { %v5692_v31 = vld [vmem:[%s5988_s16] sm:$0xff]   ;;  %v5907_v32 = vmov 0.0   ;;  %v5693_v33 = vld [vmem:[%s5988_s16 + $0x8] sm:$0xff]   ;;  %vm5908_vm4 = vmmov 0   ;;  %vm868_vm5 = vcmask 261120   ;;  %v852_v37 = vlaneseq  ;;  %s5909_s16 = smov 104  }
 0x168   : > { %5518 = vmatprep.subr.bf16.mxu0 %v5907_v32  ;;  %5526 = vmatprep.subr.bf16.mxu1 %v5907_v32  ;;  %v850_v40 = vld [vmem:[%s6013_s18] sm:$0xff]  ;;  %s5910_s28 = smov 120   ;;  %s5911_s29 = smov 112   ;;  %v5914_v56 = vmov 1983009808   ;;  %vm1829_vm6 = vcmask 64512  }
 0x169   : > { %5519 = vmatpush3.bf16.msra.mxu0 %v5692_v31  ;;  %5522 = vmatprep.mubr.msk.bf16.mxu0 %vm5908_vm4, %v5907_v32  ;;  %v6062_v38 = vshrl.u32 %v852_v37, 7  ;;  %s5912_s15 = smov 96   ;;  %s5913_s17 = smov 64   ;;  %v938_v57 = vunpack.c.l.s4 %v5914_v56  ;;  %v5915_v58 = vmov 1934713408   ;;  %vm2305_vm7 = vcmask 1043456  }
 0x16a   : > { %5520 = vmatprep.subr.bf16.mxu0 %v5907_v32  ;;  %5528 = vmatprep.mubr.msk.bf16.mxu1 %vm5908_vm4, %v5907_v32  ;;  %v970_v59 = vunpack.c.l.s4 %v5915_v58  ;;  %s5916_s13 = smov 16   ;;  %s5917_s20 = smov 8   ;;  %vm2969_vm8 = vcmask 130048   ;;  %vm2972_vm9 = vcmask 195584   ;;  %vm4923_vm10 = vcmask 254976  }
 0x16b   : > { %v6065_v39 = vsub.s32 0, %v6062_v38  ;;  %v939_v60 = vunpack.c.0.s8 %v938_v57  ;;  %s5918_s12 = smov 24   ;;  %p5650_p5 = scmp.eq.s32.totalorder %s5979_s10, 1 }
 0x16c   : > { %v551_v35 = vld [vmem:[#allocation2 + $0x8] sm:$0xff]  ;;  %v971_v63 = vunpack.c.0.s8 %v970_v59 }
 0x16d   : > { %v550_v34 = vld [vmem:[#allocation2] sm:$0xff]  ;;  %5521 = vmatpush3.bf16.msra.mxu0 %v5693_v33  ;;  %v855_v41 = vrot.slane %v850_v40, %v6065_v39  ;;  %v6110_v0 = vsub.s32 %v939_v60, %v6062_v38 }
 0x16e   : > { %v851_v36 = vpack.c.bf16 %v551_v35, %v550_v34  ;;  %5532 = vmatprep.subr.bf16.mxu0 %v5907_v32  ;;  %v6113_v7 = vsub.s32 %v971_v63, %v6062_v38 }
 0x170   : > { %5523 = vmatmul.mubr.msk.bf16.vlgmr.msra.gmra.mrb[0].mxu0 %vm868_vm5, %v851_v36 }
 0x171   : > { %5534 = vmatprep.mubr.msk.bf16.mxu0 %vm5908_vm4, %v5907_v32 }
 0x243   : > { %v906_v42 = vpop.f32.mrb[0].mxu0 }
 0x244   : > { %v907_v43 = vadd.f32 %v906_v42, %v855_v41  ;;  %v5524_v44 = vpop.f32.mrb[1].mxu0 }
 0x245   : > { %v909_v45 = vpop.f32.mrb[2].mxu0 }
 0x246   : > { %1217 = vrot.lane.b32.xlu1 %v907_v43, %s5909_s16  ;;  %1209 = vrot.lane.b32.xlu0 %v907_v43, %s5910_s28  ;;  %v5525_v46 = vpop.f32.mrb[3].mxu0  ;;  %v6070_v47 = vadd.f32 %v909_v45, %v855_v41  ;;  %v6085_v51 = vmul.f32 0.35355338, %v907_v43 }
 0x248   : > { %v6099_v54 = vmul.f32 0.35355338, %v6070_v47 }
 0x24a   : > { %1213 = vrot.lane.b32.xlu0 %v907_v43, %s5911_s29  ;;  %1211 = vrot.lane.b32.xlu1 %v6070_v47, %s5910_s28 }
 0x24e   : > { %1215 = vrot.lane.b32.xlu0 %v6070_v47, %s5911_s29  ;;  %1219 = vrot.lane.b32.xlu1 %v6070_v47, %s5909_s16 }
 0x252   : > { %1221 = vrot.lane.b32.xlu0 %v907_v43, %s5912_s15 }
 0x2b8   : > { %v6076_v48 = vpop.permute.xlu0 %1209  ;;  %v6079_v49 = vpop.permute.xlu1 %1217 }
 0x2b9   : > { %1225 = vrot.lane.b32.xlu1 %v6076_v48, %s5912_s15 }
 0x2bc   : > { %v6081_v50 = vpop.permute.xlu0 %1213  ;;  %v6092_v52 = vpop.permute.xlu1 %1211 }
 0x2bd   : > { %1229 = vrot.lane.b32.xlu0 %v6081_v50, %s5912_s15  ;;  %1233 = vrot.lane.b32.xlu1 %v6079_v49, %s5912_s15 }
 0x2c0   : > { %v6094_v53 = vpop.permute.xlu0 %1215  ;;  %v6101_v55 = vpop.permute.xlu1 %1219 }
 0x2c1   : > { %917 = vrot.lane.b32.xlu0 %v6085_v51, %s5910_s28  ;;  %923 = vrot.lane.b32.xlu1 %v6085_v51, %s5911_s29 }
 0x2c4   : > { %v1222_v61 = vpop.permute.xlu0 %1221 }
 0x2c5   : > { %929 = vrot.lane.b32.xlu0 %v6085_v51, %s5909_s16  ;;  %1223 = vrot.lane.b32.xlu1 %v6070_v47, %s5912_s15 }
 0x2c9   : > { %1231 = vrot.lane.b32.xlu1 %v6094_v53, %s5912_s15  ;;  %1227 = vrot.lane.b32.xlu0 %v6092_v52, %s5912_s15 }
 0x2cd   : > { %1235 = vrot.lane.b32.xlu0 %v6101_v55, %s5912_s15  ;;  %919 = vrot.lane.b32.xlu1 %v6099_v54, %s5910_s28 }
 0x2d1   : > { %925 = vrot.lane.b32.xlu0 %v6099_v54, %s5911_s29  ;;  %931 = vrot.lane.b32.xlu1 %v6099_v54, %s5909_s16 }
 0x2d5   : > { %1517 = vrot.lane.b32.xlu1 %v907_v43, %s5913_s17 }
 0x32b   : > { %v1226_v62 = vpop.permute.xlu1 %1225 }
 0x32f   : > { %v1230_v1 = vpop.permute.xlu0 %1229  ;;  %v1234_v2 = vpop.permute.xlu1 %1233 }
 0x330   : > { %v1245_v3 = vcombine.low %v1222_v61, %v1230_v1  ;;  %v1246_v4 = vcombine.high %v1222_v61, %v1230_v1  ;;  %v1261_v5 = vcombine.low %v1226_v62, %v1234_v2  ;;  %v1262_v6 = vcombine.high %v1226_v62, %v1234_v2 }
 0x332   : > { %v1253_v8 = vrot.slane %v1245_v3, %v6110_v0  ;;  %v1260_v9 = vrot.slane %v1246_v4, %v6110_v0  ;;  %v1269_v10 = vrot.slane %v1261_v5, %v6110_v0  ;;  %v1276_v11 = vrot.slane %v1262_v6, %v6110_v0 }
 0x333   : > { %v918_v12 = vpop.permute.xlu0 %917  ;;  %v924_v13 = vpop.permute.xlu1 %923 }
 0x334   : > { %v1277_v14 = vcombine.low %v1253_v8, %v1269_v10  ;;  %v1278_v15 = vcombine.high %v1253_v8, %v1269_v10  ;;  %v1293_v16 = vcombine.low %v1260_v9, %v1276_v11  ;;  %v1294_v17 = vcombine.high %v1260_v9, %v1276_v11 }
 0x335   : > { %v935_v22 = vcombine.low %v6085_v51, %v924_v13  ;;  %v936_v23 = vcombine.high %v6085_v51, %v924_v13 }
 0x336   : > { %v1285_v18 = vrot.slane %v1277_v14, %v6113_v7  ;;  %v1292_v19 = vrot.slane %v1278_v15, %v6113_v7  ;;  %v1301_v20 = vrot.slane %v1293_v16, %v6113_v7  ;;  %v1308_v21 = vrot.slane %v1294_v17, %v6113_v7 }
 0x337   : > { %v930_v24 = vpop.permute.xlu0 %929  ;;  %v1224_v25 = vpop.permute.xlu1 %1223  ;;  %v943_v37 = vrot.slane %v935_v22, %v6110_v0  ;;  %v950_v40 = vrot.slane %v936_v23, %v6110_v0 }
 0x338   : > { %v1381_v26 = vcombine.low %v1285_v18, %v1292_v19  ;;  %v5068_v27 = vcombine.high %v1285_v18, %v1292_v19  ;;  %v1397_v28 = vcombine.low %v1301_v20, %v1308_v21  ;;  %v5069_v29 = vcombine.high %v1301_v20, %v1308_v21 }
 0x339   : > { %v951_v30 = vcombine.low %v918_v12, %v930_v24  ;;  %v952_v31 = vcombine.high %v918_v12, %v930_v24 }
 0x33a   : > { %v6126_v33 = vrot.slane %v1381_v26, %v6110_v0  ;;  %v6129_v34 = vrot.slane %v5068_v27, %v6110_v0  ;;  %v6132_v35 = vrot.slane %v1397_v28, %v6110_v0  ;;  %v6135_v36 = vrot.slane %v5069_v29, %v6110_v0 }
 0x33b   : > { %v959_v41 = vrot.slane %v951_v30, %v6110_v0  ;;  %v966_v42 = vrot.slane %v952_v31, %v6110_v0  ;;  %v1228_v43 = vpop.permute.xlu0 %1227  ;;  %v1232_v44 = vpop.permute.xlu1 %1231 }
 0x33c   : > { %v1413_v45 = vcombine.low %v6126_v33, %v6129_v34  ;;  %v1429_v46 = vcombine.low %v6132_v35, %v6135_v36  ;;  %v1313_v59 = vcombine.low %v1224_v25, %v1232_v44  ;;  %v1314_v60 = vcombine.high %v1224_v25, %v1232_v44 }
 0x33d   : > { %v967_v51 = vcombine.low %v943_v37, %v959_v41  ;;  %v968_v56 = vcombine.high %v943_v37, %v959_v41  ;;  %v983_v57 = vcombine.low %v950_v40, %v966_v42  ;;  %v984_v58 = vcombine.high %v950_v40, %v966_v42 }
 0x33e   : > { %v1421_v61 = vrot.slane %v1413_v45, %v6113_v7  ;;  %v1437_v62 = vrot.slane %v1429_v46, %v6113_v7  ;;  %v1321_v15 = vrot.slane %v1313_v59, %v6110_v0  ;;  %v1328_v16 = vrot.slane %v1314_v60, %v6110_v0 }
 0x33f   : > { %v975_v63 = vrot.slane %v967_v51, %v6113_v7  ;;  %v982_v1 = vrot.slane %v968_v56, %v6113_v7  ;;  %v991_v2 = vrot.slane %v983_v57, %v6113_v7  ;;  %v998_v3 = vrot.slane %v984_v58, %v6113_v7  ;;  %v1236_v4 = vpop.permute.xlu0 %1235  ;;  %v920_v5 = vpop.permute.xlu1 %919 }
 0x340   : > { %v1329_v6 = vcombine.low %v1228_v43, %v1236_v4  ;;  %v1330_v8 = vcombine.high %v1228_v43, %v1236_v4  ;;  %v1445_v9 = vcombine.low %v1421_v61, %v1437_v62  ;;  %v1446_v10 = vcombine.high %v1421_v61, %v1437_v62 }
 0x341   : > { %v1071_v11 = vcombine.low %v975_v63, %v982_v1  ;;  %v5064_v12 = vcombine.high %v975_v63, %v982_v1  ;;  %v1087_v13 = vcombine.low %v991_v2, %v998_v3  ;;  %v5065_v14 = vcombine.high %v991_v2, %v998_v3 }
 0x342   : > { %v1337_v17 = vrot.slane %v1329_v6, %v6110_v0  ;;  %v1344_v18 = vrot.slane %v1330_v8, %v6110_v0  ;;  %v1821_v31 = vpack.c.bf16 %v1445_v9, %v1445_v9  ;;  %v1822_v37 = vpack.c.bf16 %v1446_v10, %v1446_v10 }
 0x343   : > { %v6156_v19 = vrot.slane %v1071_v11, %v6110_v0  ;;  %v6159_v20 = vrot.slane %v5064_v12, %v6110_v0  ;;  %v6162_v21 = vrot.slane %v1087_v13, %v6110_v0  ;;  %v6165_v22 = vrot.slane %v5065_v14, %v6110_v0  ;;  %v926_v23 = vpop.permute.xlu0 %925  ;;  %v932_v28 = vpop.permute.xlu1 %931 }
 0x344   : > { %v1345_v24 = vcombine.low %v1321_v15, %v1337_v17  ;;  %v1346_v25 = vcombine.high %v1321_v15, %v1337_v17  ;;  %v1361_v26 = vcombine.low %v1328_v16, %v1344_v18  ;;  %v1362_v27 = vcombine.high %v1328_v16, %v1344_v18 }
 0x345   : > { %v1003_v29 = vcombine.low %v6099_v54, %v926_v23  ;;  %v1004_v30 = vcombine.high %v6099_v54, %v926_v23  ;;  %v1019_v46 = vcombine.low %v920_v5, %v932_v28  ;;  %v1020_v51 = vcombine.high %v920_v5, %v932_v28 }
 0x346   : > { %v1353_v40 = vrot.slane %v1345_v24, %v6113_v7  ;;  %v1360_v41 = vrot.slane %v1346_v25, %v6113_v7  ;;  %v1369_v42 = vrot.slane %v1361_v26, %v6113_v7  ;;  %v1376_v43 = vrot.slane %v1362_v27, %v6113_v7 }
 0x347   : > { %v1011_v44 = vrot.slane %v1003_v29, %v6110_v0  ;;  %v1018_v45 = vrot.slane %v1004_v30, %v6110_v0  ;;  %v1104_v56 = vcombine.high %v6156_v19, %v6159_v20  ;;  %v1120_v54 = vcombine.high %v6162_v21, %v6165_v22 }
 0x348   : > { %v1449_v57 = vcombine.low %v1353_v40, %v1360_v41  ;;  %v1027_v58 = vrot.slane %v1019_v46, %v6110_v0  ;;  %v1034_v59 = vrot.slane %v1020_v51, %v6110_v0  ;;  %v1834_v60 = vsel %vm1829_vm6, %v1821_v31, 0 }
 0x349   : > { %v1880_v61 = vsel %vm1829_vm6, %v1822_v37, 0  ;;  %v5070_v63 = vcombine.high %v1353_v40, %v1360_v41  ;;  %v1465_v1 = vcombine.low %v1369_v42, %v1376_v43  ;;  %v5071_v2 = vcombine.high %v1369_v42, %v1376_v43  ;;  %5527 = vmatpush3.bf16.xpose.msra.mxu1 %v1834_v60 }
 0x34a   : > { %v6184_v62 = vrot.slane %v1449_v57, %v6110_v0  ;;  %v1035_v3 = vcombine.low %v1011_v44, %v1027_v58  ;;  %v1036_v4 = vcombine.high %v1011_v44, %v1027_v58  ;;  %v1051_v5 = vcombine.low %v1018_v45, %v1034_v59  ;;  %5533 = vmatpush3.bf16.xpose.msra.mxu0 %v1880_v61 }
 0x34b   : > { %v1052_v6 = vcombine.high %v1018_v45, %v1034_v59  ;;  %v1103_v8 = vcombine.low %v6156_v19, %v6159_v20  ;;  %v1119_v9 = vcombine.low %v6162_v21, %v6165_v22  ;;  %5538 = vmatprep.subr.bf16.mxu1 %v5907_v32  ;;  %5544 = vmatprep.subr.bf16.mxu0 %v5907_v32 }
 0x34c   : > { %v1414_v10 = vcombine.high %v6126_v33, %v6129_v34  ;;  %v1043_v11 = vrot.slane %v1035_v3, %v6113_v7  ;;  %v1050_v12 = vrot.slane %v1036_v4, %v6113_v7  ;;  %v1059_v13 = vrot.slane %v1051_v5, %v6113_v7 }
 0x34d   : > { %v1066_v14 = vrot.slane %v1052_v6, %v6113_v7  ;;  %v1111_v15 = vrot.slane %v1103_v8, %v6113_v7  ;;  %v1127_v16 = vrot.slane %v1119_v9, %v6113_v7  ;;  %v1430_v18 = vcombine.high %v6132_v35, %v6135_v36 }
 0x34e   : > { %v1428_v17 = vrot.slane %v1414_v10, %v6113_v7  ;;  %v1139_v19 = vcombine.low %v1043_v11, %v1050_v12  ;;  %v5066_v20 = vcombine.high %v1043_v11, %v1050_v12  ;;  %v1464_v21 = vrot.slane %v5070_v63, %v6110_v0 }
 0x34f   : > { %v1155_v33 = vcombine.low %v1059_v13, %v1066_v14  ;;  %v5067_v34 = vcombine.high %v1059_v13, %v1066_v14  ;;  %v1135_v22 = vcombine.low %v1111_v15, %v1127_v16  ;;  %v1136_v23 = vcombine.high %v1111_v15, %v1127_v16 }
 0x350   : > { %v1444_v24 = vrot.slane %v1430_v18, %v6113_v7  ;;  %v1472_v25 = vrot.slane %v1465_v1, %v6110_v0  ;;  %v1480_v26 = vrot.slane %v5071_v2, %v6110_v0  ;;  %v6208_v27 = vrot.slane %v1139_v19, %v6110_v0 }
 0x351   : > { %v1154_v28 = vrot.slane %v5066_v20, %v6110_v0  ;;  %v1813_v35 = vpack.c.bf16 %v1135_v22, %v1135_v22  ;;  %v1814_v36 = vpack.c.bf16 %v1136_v23, %v1136_v23  ;;  %v1162_v31 = vrot.slane %v1155_v33, %v6110_v0 }
 0x352   : > { %v1447_v29 = vcombine.low %v1428_v17, %v1444_v24  ;;  %v1448_v30 = vcombine.high %v1428_v17, %v1444_v24  ;;  %v1170_v37 = vrot.slane %v5067_v34, %v6110_v0  ;;  %v1118_v40 = vrot.slane %v1104_v56, %v6113_v7 }
 0x353   : > { %5529 = vmatmul.mubr.msk.bf16.vlgmr.msra.gmra.mrb[0].mxu1 %vm1829_vm6, %v1813_v35  ;;  %5535 = vmatmul.mubr.msk.bf16.vlgmr.msra.gmra.mrb[4].mxu0 %vm1829_vm6, %v1814_v36  ;;  %v1134_v43 = vrot.slane %v1120_v54, %v6113_v7  ;;  %v1481_v44 = vcombine.low %v6184_v62, %v1464_v21  ;;  %v1497_v45 = vcombine.low %v1472_v25, %v1480_v26 }
 0x354   : > { %v1823_v41 = vpack.c.bf16 %v1447_v29, %v1447_v29  ;;  %v1824_v42 = vpack.c.bf16 %v1448_v30, %v1448_v30  ;;  %5540 = vmatprep.mubr.msk.bf16.mxu1 %vm5908_vm4, %v5907_v32  ;;  %5546 = vmatprep.mubr.msk.bf16.mxu0 %vm5908_vm4, %v5907_v32  ;;  %v1171_v46 = vcombine.low %v6208_v27, %v1154_v28 }
 0x355   : > { %v1187_v57 = vcombine.low %v1162_v31, %v1170_v37  ;;  %v1489_v54 = vrot.slane %v1481_v44, %v6113_v7  ;;  %v1505_v58 = vrot.slane %v1497_v45, %v6113_v7  ;;  %v1137_v59 = vcombine.low %v1118_v40, %v1134_v43 }
 0x356   : > { %v1926_v51 = vsel %vm1829_vm6, %v1823_v41, 0  ;;  %v1972_v56 = vsel %vm1829_vm6, %v1824_v42, 0  ;;  %v1138_v60 = vcombine.high %v1118_v40, %v1134_v43  ;;  %v1482_v61 = vcombine.high %v6184_v62, %v1464_v21 }
 0x357   : > { %5539 = vmatpush3.bf16.xpose.msra.mxu1 %v1926_v51  ;;  %5545 = vmatpush3.bf16.xpose.msra.mxu0 %v1972_v56  ;;  %v1513_v63 = vcombine.low %v1489_v54, %v1505_v58  ;;  %v1514_v1 = vcombine.high %v1489_v54, %v1505_v58  ;;  %v1498_v3 = vcombine.high %v1472_v25, %v1480_v26 }
 0x358   : > { %5550 = vmatprep.subr.bf16.mxu1 %v5907_v32  ;;  %5556 = vmatprep.subr.bf16.mxu0 %v5907_v32  ;;  %v1496_v2 = vrot.slane %v1482_v61, %v6113_v7  ;;  %v1179_v6 = vrot.slane %v1171_v46, %v6113_v7  ;;  %v1815_v8 = vpack.c.bf16 %v1137_v59, %v1137_v59 }
 0x359   : > { %v1825_v4 = vpack.c.bf16 %v1513_v63, %v1513_v63  ;;  %v1826_v5 = vpack.c.bf16 %v1514_v1, %v1514_v1  ;;  %v1816_v9 = vpack.c.bf16 %v1138_v60, %v1138_v60  ;;  %v1195_v10 = vrot.slane %v1187_v57, %v6113_v7 }
 0x35a   : > { %v1512_v11 = vrot.slane %v1498_v3, %v6113_v7  ;;  %v1172_v15 = vcombine.high %v6208_v27, %v1154_v28  ;;  %v1188_v16 = vcombine.high %v1162_v31, %v1170_v37 }
 0x35b   : > { %v2018_v12 = vsel %vm1829_vm6, %v1825_v4, 0  ;;  %v2064_v13 = vsel %vm1829_vm6, %v1826_v5, 0  ;;  %v1203_v17 = vcombine.low %v1179_v6, %v1195_v10  ;;  %v1204_v18 = vcombine.high %v1179_v6, %v1195_v10 }
 0x35c   : > { %v1515_v62 = vcombine.low %v1496_v2, %v1512_v11  ;;  %v1516_v14 = vcombine.high %v1496_v2, %v1512_v11  ;;  %v1186_v21 = vrot.slane %v1172_v15, %v6113_v7  ;;  %v1202_v22 = vrot.slane %v1188_v16, %v6113_v7 }
 0x35d   : > { %v1817_v33 = vpack.c.bf16 %v1203_v17, %v1203_v17  ;;  %v1818_v34 = vpack.c.bf16 %v1204_v18, %v1204_v18 }
 0x35e   : > { %5541 = vmatmul.mubr.msk.bf16.vlgmr.msra.gmra.mrb[4].mxu1 %vm1829_vm6, %v1815_v8  ;;  %5547 = vmatmul.mubr.msk.bf16.vlgmr.msra.gmra.mrb[8].mxu0 %vm1829_vm6, %v1816_v9  ;;  %v1827_v19 = vpack.c.bf16 %v1515_v62, %v1515_v62  ;;  %v1828_v20 = vpack.c.bf16 %v1516_v14, %v1516_v14  ;;  %v1205_v25 = vcombine.low %v1186_v21, %v1202_v22 }
 0x35f   : > { %5551 = vmatpush3.bf16.xpose.msra.mxu1 %v2018_v12  ;;  %5557 = vmatpush3.bf16.xpose.msra.mxu0 %v2064_v13  ;;  %v1206_v26 = vcombine.high %v1186_v21, %v1202_v22 }
 0x360   : > { %5552 = vmatprep.mubr.msk.bf16.mxu1 %vm5908_vm4, %v5907_v32  ;;  %5558 = vmatprep.mubr.msk.bf16.mxu0 %vm5908_vm4, %v5907_v32  ;;  %v2110_v23 = vsel %vm1829_vm6, %v1827_v19, 0  ;;  %v2156_v24 = vsel %vm1829_vm6, %v1828_v20, 0  ;;  %v1819_v27 = vpack.c.bf16 %v1205_v25, %v1205_v25  ;;  %v1518_v19 = vpop.permute.xlu1 %1517 }
 0x361   : > { %5562 = vmatprep.subr.bf16.mxu1 %v5907_v32  ;;  %5568 = vmatprep.subr.bf16.mxu0 %v5907_v32  ;;  %v1820_v28 = vpack.c.bf16 %v1206_v26, %v1206_v26 }
 0x366   : > { %5553 = vmatmul.mubr.msk.bf16.vlgmr.msra.gmra.mrb[8].mxu1 %vm1829_vm6, %v1817_v33  ;;  %5559 = vmatmul.mubr.msk.bf16.vlgmr.msra.gmra.mrb[12].mxu0 %vm1829_vm6, %v1818_v34 }
 0x367   : > { %5563 = vmatpush3.bf16.xpose.msra.mxu1 %v2110_v23  ;;  %5569 = vmatpush3.bf16.xpose.msra.mxu0 %v2156_v24 }
 0x368   : > { %5564 = vmatprep.mubr.msk.bf16.mxu1 %vm5908_vm4, %v5907_v32  ;;  %5570 = vmatprep.mubr.msk.bf16.mxu0 %vm5908_vm4, %v5907_v32 }
 0x369   : > { %5574 = vmatprep.subr.bf16.mxu1 %v5907_v32  ;;  %5580 = vmatprep.subr.bf16.mxu0 %v5907_v32 }
 0x36e   : > { %5565 = vmatmul.mubr.msk.bf16.vlgmr.msra.gmra.mrb[12].mxu1 %vm1829_vm6, %v1819_v27  ;;  %5571 = vmatmul.mubr.msk.bf16.vlgmr.msra.gmra.mrb[16].mxu0 %vm1829_vm6, %v1820_v28 }
 0x36f   : > { %5576 = vmatprep.mubr.msk.bf16.mxu1 %vm5908_vm4, %v5907_v32  ;;  %5582 = vmatprep.mubr.msk.bf16.mxu0 %vm5908_vm4, %v5907_v32 }
 0x426   : > { %v1870_v35 = vpop.f32.mrb[0].mxu1  ;;  %v1916_v36 = vpop.f32.mrb[4].mxu0 }
 0x427   : > { %v5530_v29 = vpop.f32.mrb[1].mxu1  ;;  %v5536_v30 = vpop.f32.mrb[5].mxu0  ;;  %v2198_v31 = vsel %vm1829_vm6, %v1870_v35, -inf  ;;  %v2201_v37 = vsel %vm1829_vm6, %v1916_v36, -inf }
 0x428   : > { %v1873_v40 = vpop.f32.mrb[2].mxu1  ;;  %2199 = vmax.xlane.f32.xlu0 %v2198_v31  ;;  %2202 = vmax.xlane.f32.xlu1 %v2201_v37  ;;  %v1919_v41 = vpop.f32.mrb[6].mxu0 }
 0x429   : > { %v5531_v42 = vpop.f32.mrb[3].mxu1  ;;  %v5537_v43 = vpop.f32.mrb[7].mxu0 }
 0x431   : > { %v1962_v44 = vpop.f32.mrb[4].mxu1  ;;  %v2008_v45 = vpop.f32.mrb[8].mxu0 }
 0x432   : > { %v5542_v46 = vpop.f32.mrb[5].mxu1  ;;  %v5548_v51 = vpop.f32.mrb[9].mxu0  ;;  %v2204_v56 = vsel %vm1829_vm6, %v1962_v44, -inf  ;;  %v2207_v60 = vsel %vm1829_vm6, %v2008_v45, -inf }
 0x433   : > { %v1965_v57 = vpop.f32.mrb[6].mxu1  ;;  %2205 = vmax.xlane.f32.xlu0 %v2204_v56  ;;  %v2011_v54 = vpop.f32.mrb[10].mxu0 }
 0x434   : > { %v5543_v58 = vpop.f32.mrb[7].mxu1  ;;  %v5549_v59 = vpop.f32.mrb[11].mxu0 }
 0x437   : > { %2208 = vmax.xlane.f32.xlu0 %v2207_v60 }
 0x439   : > { %v2054_v61 = vpop.f32.mrb[8].mxu1  ;;  %v2100_v63 = vpop.f32.mrb[12].mxu0 }
 0x43a   : > { %v5554_v1 = vpop.f32.mrb[9].mxu1  ;;  %v5560_v2 = vpop.f32.mrb[13].mxu0  ;;  %v2210_v3 = vsel %vm1829_vm6, %v2054_v61, -inf  ;;  %v2213_v4 = vsel %vm1829_vm6, %v2100_v63, -inf }
 0x43b   : > { %v2057_v5 = vpop.f32.mrb[10].mxu1  ;;  %2211 = vmax.xlane.f32.xlu1 %v2210_v3  ;;  %2214 = vmax.xlane.f32.xlu0 %v2213_v4  ;;  %v2103_v6 = vpop.f32.mrb[14].mxu0 }
 0x43c   : > { %v5555_v8 = vpop.f32.mrb[11].mxu1  ;;  %v5561_v9 = vpop.f32.mrb[15].mxu0 }
 0x441   : > { %v6269_v10 = vpop.f32.mrb[12].mxu1  ;;  %v6271_v11 = vpop.f32.mrb[16].mxu0 }
 0x442   : > { %v5566_v12 = vpop.f32.mrb[13].mxu1  ;;  %v5572_v13 = vpop.f32.mrb[17].mxu0  ;;  %v2216_v62 = vsel %vm1829_vm6, %v6269_v10, -inf  ;;  %v2219_v14 = vsel %vm1829_vm6, %v6271_v11, -inf }
 0x443   : > { %v2149_v15 = vpop.f32.mrb[14].mxu1  ;;  %2217 = vmax.xlane.f32.xlu1 %v2216_v62  ;;  %2220 = vmax.xlane.f32.xlu0 %v2219_v14  ;;  %v2195_v16 = vpop.f32.mrb[18].mxu0 }
 0x444   : > { %v5567_v17 = vpop.f32.mrb[15].mxu1  ;;  %v5573_v18 = vpop.f32.mrb[19].mxu0 }
 0x454   : > { %1525 = vrot.lane.b32.xlu1 %v6081_v50, %s5913_s17 }
 0x458   : > { %1529 = vrot.lane.b32.xlu1 %v6079_v49, %s5913_s17 }
 0x459   : > { %1521 = vrot.lane.b32.xlu0 %v6076_v48, %s5913_s17 }
 0x45c   : > { %1519 = vrot.lane.b32.xlu1 %v6070_v47, %s5913_s17 }
 0x4b5   : > { %v2200_v20 = vpop.xlane.xlu0 %2199  ;;  %v2203_v33 = vpop.xlane.xlu1 %2202 }
 0x4b6   : > { %v2222_v34 = vsub.f32 %v1870_v35, %v2200_v20  ;;  %v2223_v21 = vsub.f32 %v1916_v36, %v2203_v33 }
 0x4b8   : > { %v2230_v22 = vmul.f32 1.442695, %v2222_v34  ;;  %v2232_v23 = vmul.f32 1.442695, %v2223_v21 }
 0x4ba   : > { %5824 = vpow2.f32 %v2230_v22 }
 0x4bb   : > { %5826 = vpow2.f32 %v2232_v23 }
 0x4c0   : > { %v2206_v24 = vpop.xlane.xlu0 %2205 }
 0x4c1   : > { %v2224_v50 = vsub.f32 %v1962_v44, %v2206_v24 }
 0x4c3   : > { %v2234_v25 = vmul.f32 1.442695, %v2224_v50 }
 0x4c4   : > { %v2209_v26 = vpop.xlane.xlu0 %2208  ;;  %v6285_v49 = vpop.eup %5824 }
 0x4c5   : > { %5828 = vpow2.f32 %v2234_v25  ;;  %v2225_v48 = vsub.f32 %v2008_v45, %v2209_v26  ;;  %v6287_v27 = vpop.eup %5826  ;;  %v2246_v47 = vsel %vm1829_vm6, %v6285_v49, 0.0 }
 0x4c6   : > { %2247 = vadd.xlane.f32.xlu1 %v2246_v47  ;;  %v2249_v35 = vsel %vm1829_vm6, %v6287_v27, 0.0 }
 0x4c7   : > { %v2236_v28 = vmul.f32 1.442695, %v2225_v48  ;;  %2250 = vadd.xlane.f32.xlu0 %v2249_v35 }
 0x4c8   : > { %v2212_v36 = vpop.xlane.xlu1 %2211  ;;  %v2215_v29 = vpop.xlane.xlu0 %2214 }
 0x4c9   : > { %5830 = vpow2.f32 %v2236_v28  ;;  %v2226_v30 = vsub.f32 %v2054_v61, %v2212_v36  ;;  %v2227_v31 = vsub.f32 %v2100_v63, %v2215_v29 }
 0x4cb   : > { %v2238_v37 = vmul.f32 1.442695, %v2226_v30  ;;  %v2240_v40 = vmul.f32 1.442695, %v2227_v31 }
 0x4cd   : > { %5832 = vpow2.f32 %v2238_v37 }
 0x4ce   : > { %5834 = vpow2.f32 %v2240_v40 }
 0x4cf   : > { %v6293_v41 = vpop.eup %5828 }
 0x4d0   : > { %v6295_v42 = vpop.xlane.xlu1 %2217  ;;  %v2252_v43 = vsel %vm1829_vm6, %v6293_v41, 0.0  ;;  %v6299_v44 = vpop.xlane.xlu0 %2220 }
 0x4d1   : > { %2253 = vadd.xlane.f32.xlu0 %v2252_v43  ;;  %v2229_v43 = vsub.f32 %v6271_v11, %v6299_v44 }
 0x4d3   : > { %v6301_v45 = vpop.eup %5830 }
 0x4d4   : > { %v1526_v46 = vpop.permute.xlu1 %1525  ;;  %v2255_v51 = vsel %vm1829_vm6, %v6301_v45, 0.0  ;;  %v1522_v58 = vpop.permute.xlu0 %1521 }
 0x4d5   : > { %2256 = vadd.xlane.f32.xlu1 %v2255_v51  ;;  %v1541_v57 = vcombine.low %v1518_v19, %v1526_v46  ;;  %v1542_v54 = vcombine.high %v1518_v19, %v1526_v46  ;;  %v2244_v46 = vmul.f32 1.442695, %v2229_v43 }
 0x4d7   : > { %v6305_v56 = vpop.eup %5832  ;;  %v1549_v2 = vrot.slane %v1541_v57, %v6110_v0  ;;  %v1556_v3 = vrot.slane %v1542_v54, %v6110_v0  ;;  %5836 = vpow2.f32 %v2244_v46 }
 0x4d8   : > { %v1530_v59 = vpop.permute.xlu1 %1529  ;;  %v2258_v60 = vsel %vm1829_vm6, %v6305_v56, 0.0  ;;  %v6309_v61 = vpop.eup %5834 }
 0x4d9   : > { %v1557_v63 = vcombine.low %v1522_v58, %v1530_v59  ;;  %v1558_v1 = vcombine.high %v1522_v58, %v1530_v59  ;;  %2259 = vadd.xlane.f32.xlu0 %v2258_v60  ;;  %v2261_v6 = vsel %vm1829_vm6, %v6309_v61, 0.0 }
 0x4db   : > { %v1565_v4 = vrot.slane %v1557_v63, %v6110_v0  ;;  %v1572_v5 = vrot.slane %v1558_v1, %v6110_v0 }
 0x4dc   : > { %v1520_v11 = vpop.permute.xlu1 %1519 }
 0x4dd   : > { %v1573_v8 = vcombine.low %v1549_v2, %v1565_v4  ;;  %v1574_v9 = vcombine.high %v1549_v2, %v1565_v4  ;;  %v1589_v12 = vcombine.low %v1556_v3, %v1572_v5  ;;  %v1590_v13 = vcombine.high %v1556_v3, %v1572_v5  ;;  %2262 = vadd.xlane.f32.xlu0 %v2261_v6 }
 0x4df   : > { %v1581_v62 = vrot.slane %v1573_v8, %v6113_v7  ;;  %v1588_v14 = vrot.slane %v1574_v9, %v6113_v7  ;;  %v1597_v15 = vrot.slane %v1589_v12, %v6113_v7  ;;  %v1604_v16 = vrot.slane %v1590_v13, %v6113_v7 }
 0x4e1   : > { %v1677_v17 = vcombine.low %v1581_v62, %v1588_v14  ;;  %v5072_v18 = vcombine.high %v1581_v62, %v1588_v14  ;;  %v1693_v19 = vcombine.low %v1597_v15, %v1604_v16  ;;  %v5073_v20 = vcombine.high %v1597_v15, %v1604_v16  ;;  %v6343_v57 = vpop.eup %5836 }
 0x4e2   : > { %v2267_v54 = vsel %vm1829_vm6, %v6343_v57, 0.0 }
 0x4e3   : > { %v1684_v33 = vrot.slane %v1677_v17, %v6110_v0  ;;  %v1692_v34 = vrot.slane %v5072_v18, %v6110_v0  ;;  %v1700_v21 = vrot.slane %v1693_v19, %v6110_v0  ;;  %v1708_v22 = vrot.slane %v5073_v20, %v6110_v0 }
 0x4e5   : > { %v1709_v23 = vcombine.low %v1684_v33, %v1692_v34  ;;  %v1725_v24 = vcombine.low %v1700_v21, %v1708_v22  ;;  %v1710_v50 = vcombine.high %v1684_v33, %v1692_v34  ;;  %v1726_v25 = vcombine.high %v1700_v21, %v1708_v22 }
 0x4e6   : > { %1527 = vrot.lane.b32.xlu1 %v6094_v53, %s5913_s17 }
 0x4e7   : > { %v1717_v26 = vrot.slane %v1709_v23, %v6113_v7  ;;  %v1733_v48 = vrot.slane %v1725_v24, %v6113_v7  ;;  %v1724_v47 = vrot.slane %v1710_v50, %v6113_v7  ;;  %v1740_v28 = vrot.slane %v1726_v25, %v6113_v7 }
 0x4e9   : > { %v1741_v35 = vcombine.low %v1717_v26, %v1733_v48  ;;  %v1742_v36 = vcombine.high %v1717_v26, %v1733_v48  ;;  %v1743_v29 = vcombine.low %v1724_v47, %v1740_v28  ;;  %v1744_v30 = vcombine.high %v1724_v47, %v1740_v28 }
 0x4ea   : > { %1531 = vrot.lane.b32.xlu1 %v6101_v55, %s5913_s17  ;;  %v2228_v55 = vsub.f32 %v6269_v10, %v6295_v42 }
 0x4eb   : > { %v2294_v31 = vpack.c.bf16 %v1741_v35, %v1741_v35  ;;  %v2295_v37 = vpack.c.bf16 %v1742_v36, %v1742_v36  ;;  %v2296_v1 = vpack.c.bf16 %v1743_v29, %v1743_v29  ;;  %v2297_v3 = vpack.c.bf16 %v1744_v30, %v1744_v30 }
 0x4ec   : > { %v2242_v51 = vmul.f32 1.442695, %v2228_v55 }
 0x4ed   : > { %v2307_v53 = vsel %vm2305_vm7, %v2294_v31, 0  ;;  %v2353_v40 = vsel %vm2305_vm7, %v2295_v37, 0  ;;  %v2399_v8 = vsel %vm2305_vm7, %v2296_v1, 0  ;;  %v2445_v9 = vsel %vm2305_vm7, %v2297_v3, 0 }
 0x4ee   : > { %5575 = vmatpush3.bf16.msra.mxu1 %v2307_v53  ;;  %5581 = vmatpush3.bf16.msra.mxu0 %v2353_v40  ;;  %5838 = vpow2.f32 %v2242_v51 }
 0x4ef   : > { %5586 = vmatprep.subr.bf16.mxu1 %v5907_v32  ;;  %5592 = vmatprep.subr.bf16.mxu0 %v5907_v32 }
 0x4f3   : > { %1523 = vrot.lane.b32.xlu0 %v6092_v52, %s5913_s17 }
 0x4f8   : > { %v6347_v58 = vpop.eup %5838 }
 0x4f9   : > { %v2264_v52 = vsel %vm1829_vm6, %v6347_v58, 0.0 }
 0x50e   : > { %2268 = vadd.xlane.f32.xlu1 %v2267_v54 }
 0x512   : > { %2265 = vadd.xlane.f32.xlu0 %v2264_v52 }
 0x553   : > { %v2248_v44 = vpop.xlane.xlu1 %2247 }
 0x554   : > { %5840 = vrcp.f32 %v2248_v44  ;;  %v2251_v10 = vpop.xlane.xlu0 %2250 }
 0x555   : > { %5842 = vrcp.f32 %v2251_v10 }
 0x55e   : > { %v2254_v42 = vpop.xlane.xlu0 %2253  ;;  %v5841_v59 = vpop.eup %5840 }
 0x55f   : > { %5844 = vrcp.f32 %v2254_v42  ;;  %v5843_v60 = vpop.eup %5842  ;;  %v2271_v63 = vmul.f32 %v5841_v59, %v6285_v49 }
 0x560   : > { %v2273_v2 = vmul.f32 %v5843_v60, %v6287_v27 }
 0x561   : > { %v2286_v5 = vpack.c.bf16 %v2271_v63, %v2271_v63 }
 0x562   : > { %v2257_v4 = vpop.xlane.xlu1 %2256  ;;  %v2287_v6 = vpack.c.bf16 %v2273_v2, %v2273_v2 }
 0x563   : > { %5846 = vrcp.f32 %v2257_v4  ;;  %5577 = vmatmul.mubr.msk.bf16.vlgmr.msra.gmra.mrb[16].mxu1 %vm1829_vm6, %v2286_v5 }
 0x564   : > { %5583 = vmatmul.mubr.msk.bf16.vlgmr.msra.gmra.mrb[20].mxu0 %vm1829_vm6, %v2287_v6  ;;  %5587 = vmatpush3.bf16.msra.mxu1 %v2399_v8 }
 0x565   : > { %5593 = vmatpush3.bf16.msra.mxu0 %v2445_v9  ;;  %5588 = vmatprep.mubr.msk.bf16.mxu1 %vm5908_vm4, %v5907_v32 }
 0x566   : > { %v2260_v12 = vpop.xlane.xlu0 %2259  ;;  %5594 = vmatprep.mubr.msk.bf16.mxu0 %vm5908_vm4, %v5907_v32  ;;  %5598 = vmatprep.subr.bf16.mxu1 %v5907_v32  ;;  %v1528_v49 = vpop.permute.xlu1 %1527 }
 0x567   : > { %5604 = vmatprep.subr.bf16.mxu0 %v5907_v32  ;;  %v1609_v16 = vcombine.low %v1520_v11, %v1528_v49  ;;  %v1610_v17 = vcombine.high %v1520_v11, %v1528_v49  ;;  %5848 = vrcp.f32 %v2260_v12 }
 0x569   : > { %v5845_v27 = vpop.eup %5844  ;;  %v1617_v22 = vrot.slane %v1609_v16, %v6110_v0 }
 0x56a   : > { %v2275_v13 = vmul.f32 %v5845_v27, %v6293_v41  ;;  %v2263_v62 = vpop.xlane.xlu0 %2262  ;;  %v1532_v19 = vpop.permute.xlu1 %1531  ;;  %v1624_v41 = vrot.slane %v1610_v17, %v6110_v0 }
 0x56b   : > { %5850 = vrcp.f32 %v2263_v62 }
 0x56c   : > { %v2288_v14 = vpack.c.bf16 %v2275_v13, %v2275_v13 }
 0x56d   : > { %v5847_v15 = vpop.eup %5846 }
 0x56e   : > { %v2277_v18 = vmul.f32 %v5847_v15, %v6301_v45  ;;  %5589 = vmatmul.mubr.msk.bf16.vlgmr.msra.gmra.mrb[20].mxu1 %vm1829_vm6, %v2288_v14  ;;  %v1524_v20 = vpop.permute.xlu0 %1523 }
 0x56f   : > { %v1625_v33 = vcombine.low %v1524_v20, %v1532_v19  ;;  %v1626_v34 = vcombine.high %v1524_v20, %v1532_v19  ;;  %5600 = vmatprep.mubr.msk.bf16.mxu1 %vm5908_vm4, %v5907_v32 }
 0x570   : > { %v2289_v21 = vpack.c.bf16 %v2277_v18, %v2277_v18 }
 0x571   : > { %v1633_v23 = vrot.slane %v1625_v33, %v6110_v0  ;;  %v1640_v24 = vrot.slane %v1626_v34, %v6110_v0  ;;  %v5849_v52 = vpop.eup %5848 }
 0x572   : > { %5595 = vmatmul.mubr.msk.bf16.vlgmr.msra.gmra.mrb[24].mxu0 %vm1829_vm6, %v2289_v21  ;;  %v2279_v3 = vmul.f32 %v5849_v52, %v6305_v56 }
 0x573   : > { %v1641_v45 = vcombine.low %v1617_v22, %v1633_v23  ;;  %v1642_v50 = vcombine.high %v1617_v22, %v1633_v23  ;;  %v1657_v25 = vcombine.low %v1624_v41, %v1640_v24  ;;  %v1658_v26 = vcombine.high %v1624_v41, %v1640_v24  ;;  %5606 = vmatprep.mubr.msk.bf16.mxu0 %vm5908_vm4, %v5907_v32 }
 0x574   : > { %v2290_v27 = vpack.c.bf16 %v2279_v3, %v2279_v3 }
 0x575   : > { %v1649_v48 = vrot.slane %v1641_v45, %v6113_v7  ;;  %v1656_v47 = vrot.slane %v1642_v50, %v6113_v7  ;;  %v1665_v28 = vrot.slane %v1657_v25, %v6113_v7  ;;  %v1672_v35 = vrot.slane %v1658_v26, %v6113_v7  ;;  %v5851_v59 = vpop.eup %5850 }
 0x576   : > { %v2281_v4 = vmul.f32 %v5851_v59, %v6309_v61 }
 0x577   : > { %v1745_v36 = vcombine.low %v1649_v48, %v1656_v47  ;;  %v5074_v29 = vcombine.high %v1649_v48, %v1656_v47  ;;  %v1761_v30 = vcombine.low %v1665_v28, %v1672_v35  ;;  %v5075_v31 = vcombine.high %v1665_v28, %v1672_v35 }
 0x578   : > { %v2291_v13 = vpack.c.bf16 %v2281_v4, %v2281_v4 }
 0x579   : > { %v1752_v37 = vrot.slane %v1745_v36, %v6110_v0  ;;  %v1760_v53 = vrot.slane %v5074_v29, %v6110_v0  ;;  %v1768_v40 = vrot.slane %v1761_v30, %v6110_v0  ;;  %v1776_v43 = vrot.slane %v5075_v31, %v6110_v0 }
 0x57b   : > { %v1777_v55 = vcombine.low %v1752_v37, %v1760_v53  ;;  %v1793_v46 = vcombine.low %v1768_v40, %v1776_v43  ;;  %v1778_v51 = vcombine.high %v1752_v37, %v1760_v53  ;;  %v1794_v54 = vcombine.high %v1768_v40, %v1776_v43 }
 0x57d   : > { %v1785_v11 = vrot.slane %v1777_v55, %v6113_v7  ;;  %v1801_v44 = vrot.slane %v1793_v46, %v6113_v7  ;;  %v1792_v10 = vrot.slane %v1778_v51, %v6113_v7  ;;  %v1808_v42 = vrot.slane %v1794_v54, %v6113_v7 }
 0x57f   : > { %v1809_v60 = vcombine.low %v1785_v11, %v1801_v44  ;;  %v1810_v63 = vcombine.high %v1785_v11, %v1801_v44  ;;  %v1811_v1 = vcombine.low %v1792_v10, %v1808_v42  ;;  %v1812_v2 = vcombine.high %v1792_v10, %v1808_v42 }
 0x581   : > { %v2298_v5 = vpack.c.bf16 %v1809_v60, %v1809_v60  ;;  %v2299_v6 = vpack.c.bf16 %v1810_v63, %v1810_v63  ;;  %v2300_v12 = vpack.c.bf16 %v1811_v1, %v1811_v1  ;;  %v2301_v49 = vpack.c.bf16 %v1812_v2, %v1812_v2 }
 0x583   : > { %v2491_v8 = vsel %vm2305_vm7, %v2298_v5, 0  ;;  %v2537_v9 = vsel %vm2305_vm7, %v2299_v6, 0  ;;  %v2583_v56 = vsel %vm2305_vm7, %v2300_v12, 0  ;;  %v2629_v61 = vsel %vm2305_vm7, %v2301_v49, 0 }
 0x584   : > { %5599 = vmatpush3.bf16.msra.mxu1 %v2491_v8  ;;  %5605 = vmatpush3.bf16.msra.mxu0 %v2537_v9 }
 0x585   : > { %5610 = vmatprep.subr.bf16.mxu1 %v5907_v32  ;;  %5616 = vmatprep.subr.bf16.mxu0 %v5907_v32 }
 0x587   : > { %5601 = vmatmul.mubr.msk.bf16.vlgmr.msra.gmra.mrb[24].mxu1 %vm1829_vm6, %v2290_v27  ;;  %5607 = vmatmul.mubr.msk.bf16.vlgmr.msra.gmra.mrb[28].mxu0 %vm1829_vm6, %v2291_v13 }
 0x588   : > { %5611 = vmatpush3.bf16.msra.mxu1 %v2583_v56  ;;  %5617 = vmatpush3.bf16.msra.mxu0 %v2629_v61 }
 0x589   : > { %5618 = vmatprep.mubr.msk.bf16.mxu0 %vm5908_vm4, %v5907_v32  ;;  %5612 = vmatprep.mubr.msk.bf16.mxu1 %vm5908_vm4, %v5907_v32 }
 0x58a   : > { %5622 = vmatprep.subr.bf16.mxu1 %v5907_v32 }
 0x59b   : > { %v2269_v62 = vpop.xlane.xlu1 %2268 }
 0x59c   : > { %5852 = vrcp.f32 %v2269_v62 }
 0x59f   : > { %v2266_v14 = vpop.xlane.xlu0 %2265 }
 0x5a0   : > { %5854 = vrcp.f32 %v2266_v14 }
 0x5a6   : > { %v5853_v15 = vpop.eup %5852 }
 0x5a7   : > { %v2285_v16 = vmul.f32 %v5853_v15, %v6343_v57 }
 0x5a9   : > { %v2293_v17 = vpack.c.bf16 %v2285_v16, %v2285_v16 }
 0x5aa   : > { %v5855_v18 = vpop.eup %5854 }
 0x5ab   : > { %v2283_v19 = vmul.f32 %v5855_v18, %v6347_v58  ;;  %5619 = vmatmul.mubr.msk.bf16.vlgmr.msra.gmra.mrb[32].mxu0 %vm1829_vm6, %v2293_v17 }
 0x5ad   : > { %v2292_v20 = vpack.c.bf16 %v2283_v19, %v2283_v19 }
 0x5af   : > { %5613 = vmatmul.mubr.msk.bf16.vlgmr.msra.gmra.mrb[28].mxu1 %vm1829_vm6, %v2292_v20 }
 0x5b0   : > { %5626 = vmatprep.mubr.msk.bf16.mxu1 %vm5908_vm4, %v5907_v32 }
 0x636   : > { %v2343_v33 = vpop.f32.mrb[16].mxu1 }
 0x637   : > { %v2389_v34 = vpop.f32.mrb[20].mxu0  ;;  %v5578_v21 = vpop.f32.mrb[17].mxu1 }
 0x638   : > { %v5584_v22 = vpop.f32.mrb[21].mxu0  ;;  %v2346_v41 = vpop.f32.mrb[18].mxu1 }
 0x639   : > { %v2392_v23 = vpop.f32.mrb[22].mxu0  ;;  %v5579_v24 = vpop.f32.mrb[19].mxu1 }
 0x63a   : > { %v5585_v57 = vpop.f32.mrb[23].mxu0 }
 0x641   : > { %v2435_v45 = vpop.f32.mrb[20].mxu1 }
 0x642   : > { %v2671_v50 = vcombine.low %v2343_v33, %v2435_v45  ;;  %v2672_v25 = vcombine.high %v2343_v33, %v2435_v45  ;;  %v5590_v58 = vpop.f32.mrb[21].mxu1 }
 0x643   : > { %v2438_v26 = vpop.f32.mrb[22].mxu1 }
 0x644   : > { %v5591_v48 = vpop.f32.mrb[23].mxu1  ;;  %v2679_v30 = vrot.slane %v2671_v50, %v6110_v0  ;;  %v2686_v31 = vrot.slane %v2672_v25, %v6110_v0 }
 0x645   : > { %v2481_v47 = vpop.f32.mrb[24].mxu0 }
 0x646   : > { %v2687_v28 = vcombine.low %v2389_v34, %v2481_v47  ;;  %v2688_v35 = vcombine.high %v2389_v34, %v2481_v47  ;;  %v5596_v36 = vpop.f32.mrb[25].mxu0 }
 0x647   : > { %v2484_v29 = vpop.f32.mrb[26].mxu0 }
 0x648   : > { %v2695_v37 = vrot.slane %v2687_v28, %v6110_v0  ;;  %v2702_v53 = vrot.slane %v2688_v35, %v6110_v0  ;;  %v5597_v40 = vpop.f32.mrb[27].mxu0 }
 0x64a   : > { %v2703_v43 = vcombine.low %v2679_v30, %v2695_v37  ;;  %v2704_v55 = vcombine.high %v2679_v30, %v2695_v37  ;;  %v2719_v46 = vcombine.low %v2686_v31, %v2702_v53  ;;  %v2720_v51 = vcombine.high %v2686_v31, %v2702_v53 }
 0x64c   : > { %v2711_v54 = vrot.slane %v2703_v43, %v6113_v7  ;;  %v2718_v52 = vrot.slane %v2704_v55, %v6113_v7  ;;  %v2727_v11 = vrot.slane %v2719_v46, %v6113_v7  ;;  %v2734_v44 = vrot.slane %v2720_v51, %v6113_v7 }
 0x64e   : > { %v2807_v10 = vcombine.low %v2711_v54, %v2718_v52  ;;  %v5092_v42 = vcombine.high %v2711_v54, %v2718_v52  ;;  %v2823_v59 = vcombine.low %v2727_v11, %v2734_v44  ;;  %v5093_v60 = vcombine.high %v2727_v11, %v2734_v44  ;;  %v5694_v52 = vld [vmem:[%s5993_s19] sm:$0xff]  }
 0x64f   : > { %5623 = vmatpush3.bf16.msra.mxu1 %v5694_v52 }
 0x650   : > { %v2814_v63 = vrot.slane %v2807_v10, %v6110_v0  ;;  %v2822_v1 = vrot.slane %v5092_v42, %v6110_v0  ;;  %v2830_v2 = vrot.slane %v2823_v59, %v6110_v0  ;;  %v2838_v3 = vrot.slane %v5093_v60, %v6110_v0  ;;  %5624 = vmatprep.subr.bf16.mxu1 %v5907_v32 }
 0x652   : > { %v2840_v4 = vcombine.high %v2814_v63, %v2822_v1  ;;  %v2856_v5 = vcombine.high %v2830_v2, %v2838_v3  ;;  %v2839_v6 = vcombine.low %v2814_v63, %v2822_v1  ;;  %v2855_v8 = vcombine.low %v2830_v2, %v2838_v3 }
 0x654   : > { %v6421_v9 = vrot.slane %v2840_v4, %v6113_v7  ;;  %v6424_v12 = vrot.slane %v2856_v5, %v6113_v7  ;;  %v6427_v49 = vrot.slane %v2839_v6, %v6113_v7  ;;  %v6430_v27 = vrot.slane %v2855_v8, %v6113_v7  ;;  %v5695_v6 = vld [vmem:[%s5993_s19 + $0x8] sm:$0xff]   ;;  %s5920_s19 = smov [#allocation3]  }
 0x655   : > { %5625 = vmatpush3.bf16.msra.mxu1 %v5695_v6 }
 0x656   : > { %v2873_v13 = vcombine.low %v6421_v9, %v6424_v12  ;;  %v2871_v56 = vcombine.low %v6427_v49, %v6430_v27  ;;  %v2872_v61 = vcombine.high %v6427_v49, %v6430_v27  ;;  %v2874_v62 = vcombine.high %v6421_v9, %v6424_v12  ;;  %v6469_v49 = vld [vmem:[%s6013_s18] sm:$0xff] }
 0x65a   : > { %v2527_v14 = vpop.f32.mrb[24].mxu1  ;;  %v2573_v15 = vpop.f32.mrb[28].mxu0 }
 0x65b   : > { %v5602_v16 = vpop.f32.mrb[25].mxu1  ;;  %v5608_v17 = vpop.f32.mrb[29].mxu0 }
 0x65c   : > { %v2530_v18 = vpop.f32.mrb[26].mxu1  ;;  %v2576_v19 = vpop.f32.mrb[30].mxu0 }
 0x65d   : > { %v5603_v20 = vpop.f32.mrb[27].mxu1  ;;  %v5609_v33 = vpop.f32.mrb[31].mxu0 }
 0x67e   : > { %v2665_v34 = vpop.f32.mrb[32].mxu0 }
 0x67f   : > { %v2755_v21 = vcombine.low %v2573_v15, %v2665_v34  ;;  %v2756_v22 = vcombine.high %v2573_v15, %v2665_v34  ;;  %v5620_v41 = vpop.f32.mrb[33].mxu0 }
 0x680   : > { %v2668_v23 = vpop.f32.mrb[34].mxu0 }
 0x681   : > { %v5621_v24 = vpop.f32.mrb[35].mxu0  ;;  %v2763_v26 = vrot.slane %v2755_v21, %v6110_v0  ;;  %v2770_v48 = vrot.slane %v2756_v22, %v6110_v0 }
 0x682   : > { %v2619_v57 = vpop.f32.mrb[28].mxu1 }
 0x683   : > { %v2739_v45 = vcombine.low %v2527_v14, %v2619_v57  ;;  %v2740_v50 = vcombine.high %v2527_v14, %v2619_v57  ;;  %v5614_v25 = vpop.f32.mrb[29].mxu1 }
 0x684   : > { %v2622_v58 = vpop.f32.mrb[30].mxu1  ;;  %v6466_v25 = vsub.s32 1, %v6062_v38 }
 0x685   : > { %v2747_v47 = vrot.slane %v2739_v45, %v6110_v0  ;;  %v2754_v28 = vrot.slane %v2740_v50, %v6110_v0  ;;  %v5615_v35 = vpop.f32.mrb[31].mxu1 }
 0x686   : > { %v2979_v27 = vrot.slane %v6469_v49, %v6466_v25  ;;  %v5865_v35 = vld [vmem:[#allocation2] sm:$0xff] }
 0x687   : > { %v2771_v36 = vcombine.low %v2747_v47, %v2763_v26  ;;  %v2772_v29 = vcombine.high %v2747_v47, %v2763_v26  ;;  %v2787_v30 = vcombine.low %v2754_v28, %v2770_v48  ;;  %v2788_v31 = vcombine.high %v2754_v28, %v2770_v48 }
 0x689   : > { %v2779_v37 = vrot.slane %v2771_v36, %v6113_v7  ;;  %v2786_v53 = vrot.slane %v2772_v29, %v6113_v7  ;;  %v2795_v40 = vrot.slane %v2787_v30, %v6113_v7  ;;  %v2802_v43 = vrot.slane %v2788_v31, %v6113_v7  ;;  %v5866_v30 = vld [vmem:[#allocation2 + $0x8] sm:$0xff] }
 0x68b   : > { %v2875_v55 = vcombine.low %v2779_v37, %v2786_v53  ;;  %v5094_v46 = vcombine.high %v2779_v37, %v2786_v53  ;;  %v2891_v51 = vcombine.low %v2795_v40, %v2802_v43  ;;  %v5095_v54 = vcombine.high %v2795_v40, %v2802_v43 }
 0x68d   : > { %v2882_v11 = vrot.slane %v2875_v55, %v6110_v0  ;;  %v2890_v44 = vrot.slane %v5094_v46, %v6110_v0  ;;  %v2898_v10 = vrot.slane %v2891_v51, %v6110_v0  ;;  %v2906_v42 = vrot.slane %v5095_v54, %v6110_v0 }
 0x68f   : > { %v2908_v59 = vcombine.high %v2882_v11, %v2890_v44  ;;  %v2924_v60 = vcombine.high %v2898_v10, %v2906_v42  ;;  %v2907_v63 = vcombine.low %v2882_v11, %v2890_v44  ;;  %v2923_v1 = vcombine.low %v2898_v10, %v2906_v42  ;;  %v560_v10 = vld [vmem:[%s5998_s22] sm:$0xff] }
 0x690   : > { %v568_v42 = vld [vmem:[%s5998_s22 + $0x40] sm:$0xff] }
 0x691   : > { %v2922_v2 = vrot.slane %v2908_v59, %v6113_v7  ;;  %v2938_v3 = vrot.slane %v2924_v60, %v6113_v7  ;;  %v2915_v4 = vrot.slane %v2907_v63, %v6113_v7  ;;  %v2931_v5 = vrot.slane %v2923_v1, %v6113_v7  ;;  %v561_v59 = vld [vmem:[%s5998_s22 + $0x8] sm:$0xff] }
 0x692   : > { %v5099_v60 = vcombine.low %v560_v10, %v568_v42  ;;  %v5100_v63 = vcombine.high %v560_v10, %v568_v42  ;;  %v569_v1 = vld [vmem:[%s5998_s22 + $0x48] sm:$0xff]  ;;  %v580_v10 = vld [vmem:[%s5998_s22 + $0xa0] sm:$0xff] }
 0x693   : > { %v2941_v8 = vcombine.low %v2922_v2, %v2938_v3  ;;  %v2940_v9 = vcombine.high %v2915_v4, %v2931_v5  ;;  %v2939_v12 = vcombine.low %v2915_v4, %v2931_v5  ;;  %v2942_v14 = vcombine.high %v2922_v2, %v2938_v3  ;;  %v576_v2 = vld [vmem:[%s5998_s22 + $0x80] sm:$0xff] }
 0x694   : > { %v584_v3 = vld [vmem:[%s5998_s22 + $0xc0] sm:$0xff]  ;;  %v5101_v4 = vcombine.low %v561_v59, %v569_v1  ;;  %v5102_v5 = vcombine.high %v561_v59, %v569_v1  ;;  %3323 = vmatprep.subr.bf16.mxu0 %v5100_v63  ;;  %v581_v59 = vld [vmem:[%s5998_s22 + $0xa8] sm:$0xff] }
 0x695   : > { %v5682_v15 = vpack.i.bf16 %v2941_v8, %v2873_v13  ;;  %v5677_v16 = vpack.i.bf16 %v2940_v9, %v2872_v61  ;;  %v5687_v17 = vpack.i.bf16 %v2942_v14, %v2874_v62  ;;  %v5116_v6 = vcombine.high %v576_v2, %v584_v3  ;;  %v577_v8 = vld [vmem:[%s5998_s22 + $0x88] sm:$0xff]  ;;  %3324 = vmatpush1.bf16.msra.mxu0 %v5099_v60  ;;  %v588_v42 = vld [vmem:[%s5998_s22 + $0xe0] sm:$0xff] }
 0x696   : > { %v585_v9 = vld [vmem:[%s5998_s22 + $0xc8] sm:$0xff]  ;;  %3366 = vmatprep.subr.bf16.mxu1 %v5102_v5  ;;  %v574_v5 = vld [vmem:[%s5998_s22 + $0x70] sm:$0xff] }
 0x697   : > { %5683 = vrot.lane.b32.xlu1 %v5682_v15, %s5916_s13  ;;  %5678 = vrot.lane.b32.xlu0 %v5677_v16, %s5917_s20  ;;  %v5118_v14 = vcombine.high %v577_v8, %v585_v9  ;;  %v562_v15 = vld [vmem:[%s5998_s22 + $0x10] sm:$0xff]  ;;  %v589_v60 = vld [vmem:[%s5998_s22 + $0xe8] sm:$0xff] }
 0x698   : > { %v570_v16 = vld [vmem:[%s5998_s22 + $0x50] sm:$0xff]  ;;  %3325 = vmatprep.subr.bf16.mxu0 %v5116_v6  ;;  %v567_v6 = vld [vmem:[%s5998_s22 + $0x38] sm:$0xff] }
 0x69b   : > { %5688 = vrot.lane.b32.xlu0 %v5687_v17, %s5918_s12  ;;  %v563_v17 = vld [vmem:[%s5998_s22 + $0x18] sm:$0xff] }
 0x709   : > { %v5684_v18 = vpop.permute.xlu1 %5683  ;;  %v5679_v19 = vpop.permute.xlu0 %5678 }
 0x70a   : > { %v5681_v20 = vunpack.i.h.bf16 %v5679_v19  ;;  %v5680_v33 = vunpack.i.l.bf16 %v5679_v19  ;;  %v5686_v34 = vunpack.i.h.bf16 %v5684_v18  ;;  %v5685_v21 = vunpack.i.l.bf16 %v5684_v18 }
 0x70b   : > { %v5115_v18 = vcombine.low %v576_v2, %v584_v3  ;;  %v5103_v19 = vcombine.low %v562_v15, %v570_v16  ;;  %v5124_v2 = vcombine.high %v580_v10, %v588_v42  ;;  %v5126_v3 = vcombine.high %v581_v59, %v589_v60 }
 0x70c   : > { %v2967_v13 = vsel %vm1829_vm6, %v2871_v56, %v5680_v33  ;;  %v2968_v61 = vsel %vm1829_vm6, %v2939_v12, %v5681_v20  ;;  %v5919_v12 = vmov 0   ;;  %v571_v20 = vld [vmem:[%s5998_s22 + $0x58] sm:$0xff]  ;;  %v5117_v33 = vcombine.low %v577_v8, %v585_v9 }
 0x70d   : > { %v5689_v62 = vpop.permute.xlu0 %5688  ;;  %v2970_v23 = vsel %vm2969_vm8, %v2967_v13, %v5685_v21  ;;  %v2971_v24 = vsel %vm2969_vm8, %v2968_v61, %v5686_v34  ;;  %3355 = vmatprep.mubr.bf16.mxu0 %v5919_v12  ;;  %v5104_v34 = vcombine.high %v562_v15, %v570_v16  ;;  %v5105_v21 = vcombine.low %v563_v17, %v571_v20  ;;  %v575_v8 = vld [vmem:[%s5998_s22 + $0x78] sm:$0xff] }
 0x70e   : > { %v5691_v22 = vunpack.i.h.bf16 %v5689_v62  ;;  %v5690_v41 = vunpack.i.l.bf16 %v5689_v62  ;;  %v5106_v13 = vcombine.high %v563_v17, %v571_v20  ;;  %3326 = vmatpush1.bf16.msra.mxu0 %v5115_v18  ;;  %v5123_v9 = vcombine.low %v580_v10, %v588_v42  ;;  %v582_v17 = vld [vmem:[%s5998_s22 + $0xb0] sm:$0xff]  ;;  %v591_v20 = vld [vmem:[%s5998_s22 + $0xf8] sm:$0xff] }
 0x70f   : > { %3409 = vmatprep.subr.bf16.mxu0 %v5104_v34  ;;  %v5114_v16 = vcombine.high %v567_v6, %v575_v8  ;;  %v590_v18 = vld [vmem:[%s5998_s22 + $0xf0] sm:$0xff]  ;;  %v5113_v34 = vcombine.low %v567_v6, %v575_v8  ;;  %v5724_v10 = vld [vmem:[%s6008_s14 + $0x78] sm:$0xff]  }
 0x710   : > { %v2973_v57 = vsel %vm2972_vm9, %v2970_v23, %v5690_v41  ;;  %v2974_v45 = vsel %vm2972_vm9, %v2971_v24, %v5691_v22  ;;  %v5725_v42 = vld [vmem:[%s6008_s14 + $0xf8] sm:$0xff]  }
 0x711   : > { %v2975_v50 = vpack.c.bf16 %v2974_v45, %v2973_v57  ;;  %v6492_v57 = vsub.s32 2, %v6062_v38 }
 0x713   : > { %5627 = vmatmul.mubr.msk.bf16.vlgmr.msra.gmra.mrb[32].mxu1 %vm868_vm5, %v2975_v50  ;;  %v3068_v45 = vrot.slane %v6469_v49, %v6492_v57  ;;  %v6497_v50 = vsub.s32 3, %v6062_v38 }
 0x714   : > { %3398 = vmatprep.mubr.bf16.mxu1 %v5919_v12  ;;  %3367 = vmatpush1.bf16.msra.mxu1 %v5101_v4  ;;  %v566_v4 = vld [vmem:[%s5998_s22 + $0x30] sm:$0xff] }
 0x715   : > { %3368 = vmatprep.subr.bf16.mxu1 %v5118_v14  ;;  %v5125_v14 = vcombine.low %v581_v59, %v589_v60  ;;  %v5112_v15 = vcombine.high %v566_v4, %v574_v5  ;;  %v5726_v59 = vld [vmem:[%s6008_s14 + $0x38] sm:$0xff]  }
 0x716   : > { %v5727_v60 = vld [vmem:[%s6008_s14 + $0xb8] sm:$0xff]  }
 0x718   : > { %3369 = vmatpush1.bf16.msra.mxu1 %v5117_v33  ;;  %v5111_v33 = vcombine.low %v566_v4, %v574_v5  ;;  %v592_v5 = vld [vmem:[%s6003_s25] sm:$0xff] }
 0x719   : > { %3452 = vmatprep.subr.bf16.mxu1 %v5106_v13  ;;  %v3083_v6 = vrot.slane %v592_v5, %v6065_v39  ;;  %v3091_v8 = vrot.slane %v592_v5, %v6492_v57 }
 0x7e6   : > { %v3029_v56 = vpop.f32.mrb[32].mxu1 }
 0x7e7   : > { %v3030_v58 = vadd.f32 %v3029_v56, %v2979_v27  ;;  %v5628_v26 = vpop.f32.mrb[33].mxu1 }
 0x7e8   : > { %v3032_v48 = vpop.f32.mrb[34].mxu1  ;;  %v3074_v26 = vrot.slane %v6469_v49, %v6497_v50  ;;  %v564_v49 = vld [vmem:[%s5998_s22 + $0x20] sm:$0xff] }
 0x7e9   : > { %v3033_v47 = vadd.f32 %v3032_v48, %v2979_v27  ;;  %v5629_v28 = vpop.f32.mrb[35].mxu1  ;;  %v3036_v36 = vadd.f32 %v5865_v35, %v3030_v58  ;;  %v578_v35 = vld [vmem:[%s5998_s22 + $0x90] sm:$0xff] }
 0x7eb   : > { %v3038_v29 = vsel %vm868_vm5, %v3036_v36, 0.0  ;;  %v3037_v31 = vadd.f32 %v5866_v30, %v3033_v47  ;;  %v587_v30 = vld [vmem:[%s5998_s22 + $0xd8] sm:$0xff] }
 0x7ec   : > { %3039 = vadd.xlane.f32.xlu1 %v3038_v29  ;;  %v579_v29 = vld [vmem:[%s5998_s22 + $0x98] sm:$0xff] }
 0x7ed   : > { %v3041_v37 = vsel %vm868_vm5, %v3037_v31, 0.0 }
 0x7ee   : > { %3042 = vadd.xlane.f32.xlu0 %v3041_v37 }
 0x879   : > { %v3040_v53 = vpop.xlane.xlu1 %3039 }
 0x87a   : > { %v3045_v40 = vmul.f32 0.03125, %v3040_v53 }
 0x87b   : > { %v3043_v43 = vpop.xlane.xlu0 %3042 }
 0x87c   : > { %v3047_v55 = vsub.f32 %v3036_v36, %v3045_v40  ;;  %v3046_v46 = vmul.f32 0.03125, %v3043_v43  ;;  %v586_v36 = vld [vmem:[%s5998_s22 + $0xd0] sm:$0xff]  ;;  %v5122_v43 = vcombine.high %v579_v29, %v587_v30 }
 0x87d   : > { %v5120_v40 = vcombine.high %v578_v35, %v586_v36 }
 0x87e   : > { %v3048_v51 = vsub.f32 %v3037_v31, %v3046_v46  ;;  %v3049_v54 = vmul.f32 %v3047_v55, %v3047_v55  ;;  %v565_v46 = vld [vmem:[%s5998_s22 + $0x28] sm:$0xff] }
 0x880   : > { %v3051_v52 = vsel %vm868_vm5, %v3049_v54, 0.0  ;;  %v3050_v11 = vmul.f32 %v3048_v51, %v3048_v51  ;;  %v5119_v54 = vcombine.low %v578_v35, %v586_v36  ;;  %v5709_v35 = vld [vmem:[%s6008_s14 + $0xd8] sm:$0xff]  }
 0x881   : > { %3052 = vadd.xlane.f32.xlu0 %v3051_v52  ;;  %v5121_v52 = vcombine.low %v579_v29, %v587_v30  ;;  %v5710_v36 = vld [vmem:[%s6008_s14 + $0x18] sm:$0xff]   ;;  %v5712_v30 = vld [vmem:[%s6008_s14 + $0x60] sm:$0xff]  }
 0x882   : > { %v3054_v44 = vsel %vm868_vm5, %v3050_v11, 0.0  ;;  %v5711_v29 = vld [vmem:[%s6008_s14 + $0x98] sm:$0xff]  }
 0x883   : > { %3055 = vadd.xlane.f32.xlu1 %v3054_v44 }
 0x90e   : > { %v3053_v61 = vpop.xlane.xlu0 %3052 }
 0x90f   : > { %v3057_v62 = vmul.f32 0.03125, %v3053_v61  ;;  %v5127_v61 = vcombine.low %v582_v17, %v590_v18 }
 0x910   : > { %v3056_v22 = vpop.xlane.xlu1 %3055 }
 0x911   : > { %v3059_v41 = vadd.f32 1e-05, %v3057_v62  ;;  %v3058_v23 = vmul.f32 0.03125, %v3056_v22  ;;  %v5696_v22 = vld [vmem:[%s6008_s14 + $0x40] sm:$0xff]  }
 0x913   : > { %5856 = vrsqrt.f32 %v3059_v41  ;;  %v3060_v24 = vadd.f32 1e-05, %v3058_v23  ;;  %v5697_v41 = vld [vmem:[%s6008_s14 + $0xc0] sm:$0xff]  }
 0x914   : > { %v5698_v23 = vld [vmem:[%s6008_s14] sm:$0xff]  }
 0x915   : > { %5858 = vrsqrt.f32 %v3060_v24  ;;  %v5699_v24 = vld [vmem:[%s6008_s14 + $0x80] sm:$0xff]  }
 0x91d   : > { %v5857_v27 = vpop.eup %5856 }
 0x91e   : > { %v3063_v56 = vmul.f32 %v5857_v27, %v3047_v55  ;;  %v572_v55 = vld [vmem:[%s5998_s22 + $0x60] sm:$0xff]  ;;  %v5701_v27 = vld [vmem:[%s6008_s14 + $0xc8] sm:$0xff]  }
 0x91f   : > { %v5859_v58 = vpop.eup %5858  ;;  %v5108_v11 = vcombine.high %v564_v49, %v572_v55  ;;  %v5107_v63 = vcombine.low %v564_v49, %v572_v55  ;;  %v5716_v49 = vld [vmem:[%s6008_s14 + $0x68] sm:$0xff]  }
 0x920   : > { %v3069_v48 = vmul.f32 %v3068_v45, %v3063_v56  ;;  %v3064_v47 = vmul.f32 %v5859_v58, %v3048_v51  ;;  %v573_v51 = vld [vmem:[%s5998_s22 + $0x68] sm:$0xff]  ;;  %v5704_v58 = vld [vmem:[%s6008_s14 + $0x50] sm:$0xff]  }
 0x921   : > { %v5110_v44 = vcombine.high %v565_v46, %v573_v51  ;;  %v5109_v1 = vcombine.low %v565_v46, %v573_v51  ;;  %v5703_v56 = vld [vmem:[%s6008_s14 + $0x88] sm:$0xff]  }
 0x922   : > { %v3070_v28 = vmul.f32 %v3068_v45, %v3064_v47  ;;  %v6505_v31 = vadd.f32 %v3074_v26, %v3069_v48  ;;  %v5700_v45 = vld [vmem:[%s6008_s14 + $0x48] sm:$0xff]   ;;  %v5706_v48 = vld [vmem:[%s6008_s14 + $0x10] sm:$0xff]  }
 0x923   : > { %v5707_v47 = vld [vmem:[%s6008_s14 + $0x90] sm:$0xff]   ;;  %v5717_v55 = vld [vmem:[%s6008_s14 + $0xe8] sm:$0xff]  }
 0x924   : > { %v6507_v37 = vadd.f32 %v3074_v26, %v3070_v28  ;;  %v5705_v26 = vld [vmem:[%s6008_s14 + $0xd0] sm:$0xff]   ;;  %v5708_v28 = vld [vmem:[%s6008_s14 + $0x58] sm:$0xff]   ;;  %v5718_v46 = vld [vmem:[%s6008_s14 + $0x28] sm:$0xff]  }
 0x925   : > { %v5719_v51 = vld [vmem:[%s6008_s14 + $0xa8] sm:$0xff]  }
 0x926   : > { %v6511_v53 = vpack.c.bf16 %v6507_v37, %v6505_v31 }
 0x928   : > { %5131 = vmatmul.mubr.msk.bf16.vlgmr.msra.gmra.mrb[36].mxu0 %vm868_vm5, %v6511_v53  ;;  %5132 = vmatmul.mubr.msk.bf16.vlgmr.msra.gmra.mrb[36].mxu1 %vm868_vm5, %v6511_v53 }
 0x929   : > { %3410 = vmatpush1.bf16.msra.mxu0 %v5103_v19  ;;  %3453 = vmatpush1.bf16.msra.mxu1 %v5105_v21  ;;  %v583_v19 = vld [vmem:[%s5998_s22 + $0xb8] sm:$0xff]  ;;  %v5128_v21 = vcombine.high %v582_v17, %v590_v18  ;;  %v6604_v18 = vsub.s32 5, %v6062_v38  ;;  %s4938_s22 = sshll.u32 %s5920_s19, 4  ;;  %s4939_s22 = int_to_ptr.vmem [resolvable:$true] %s4938_s22 }
 0x92a   : > { %3411 = vmatprep.subr.bf16.mxu0 %v5120_v40  ;;  %3454 = vmatprep.subr.bf16.mxu1 %v5122_v43  ;;  %v5130_v13 = vcombine.high %v583_v19, %v591_v20  ;;  %v5129_v62 = vcombine.low %v583_v19, %v591_v20  ;;  %v5714_v40 = vld [vmem:[%s6008_s14 + $0x20] sm:$0xff]   ;;  %v3110_v19 = vsub.s32 7, %v6062_v38  ;;  %p5875_p9 = scmp.lt.s32.totalorder %s4939_s22, %s4939_s22 }
 0x92b   : > { %3441 = vmatprep.mubr.bf16.mxu0 %v5919_v12  ;;  %3484 = vmatprep.mubr.bf16.mxu1 %v5919_v12  ;;  %v5715_v43 = vld [vmem:[%s6008_s14 + $0xa0] sm:$0xff]  }
 0x92d   : > { %3412 = vmatpush1.bf16.msra.mxu0 %v5119_v54  ;;  %3455 = vmatpush1.bf16.msra.mxu1 %v5121_v52  ;;  %v5720_v54 = vld [vmem:[%s6008_s14 + $0x70] sm:$0xff]  }
 0x92e   : > { %3495 = vmatprep.subr.bf16.mxu0 %v5108_v11  ;;  %3538 = vmatprep.subr.bf16.mxu1 %v5110_v44  ;;  %v5721_v52 = vld [vmem:[%s6008_s14 + $0xf0] sm:$0xff]  }
 0x92f   : > { %v5722_v11 = vld [vmem:[%s6008_s14 + $0x30] sm:$0xff]  }
 0x930   : > { %5133 = vmatmul.mubr.msk.bf16.vlgmr.msra.gmra.mrb[40].mxu0 %vm868_vm5, %v6511_v53  ;;  %5134 = vmatmul.mubr.msk.bf16.vlgmr.msra.gmra.mrb[40].mxu1 %vm868_vm5, %v6511_v53  ;;  %v5723_v44 = vld [vmem:[%s6008_s14 + $0xb0] sm:$0xff]  }
 0x931   : > { %3496 = vmatpush1.bf16.msra.mxu0 %v5107_v63  ;;  %3539 = vmatpush1.bf16.msra.mxu1 %v5109_v1  ;;  %v5728_v63 = vld [vmem:[%s6008_s14 + $0x140] sm:$0xff]  }
 0x932   : > { %3497 = vmatprep.subr.bf16.mxu0 %v5124_v2  ;;  %3540 = vmatprep.subr.bf16.mxu1 %v5126_v3  ;;  %v5729_v1 = vld [vmem:[%s6008_s14 + $0x1c0] sm:$0xff]   ;;  %v6586_v2 = vsub.s32 6, %v6062_v38  ;;  %v6589_v3 = vld [vmem:[%s6003_s25 + $0x8] sm:$0xff]  ;;  %s5868_s25 = scalar_lea.vmem %s4939_s22, 256 }
 0x933   : > { %3527 = vmatprep.mubr.bf16.mxu0 %v5919_v12  ;;  %3570 = vmatprep.mubr.bf16.mxu1 %v5919_v12  ;;  %p5869_p6 = scmp.ne.s32.totalorder %s4939_s22, %s5868_s25  ;;  %p5876_p10 = scmp.lt.s32.totalorder %s5868_s25, %s5868_s25 }
 0x934   : > { %v6593_v4 = vrot.slane %v6589_v3, %v6586_v2 }
 0x935   : > { %3498 = vmatpush1.bf16.msra.mxu0 %v5123_v9  ;;  %3541 = vmatpush1.bf16.msra.mxu1 %v5125_v14  ;;  %v3087_v9 = vrot.slane %v592_v5, %v6466_v25  ;;  %v3095_v14 = vrot.slane %v592_v5, %v6497_v50  ;;  %p5870_p7 = pnand %p5869_p6, %p5650_p5  ;;  %p5877_p11 = por %p5876_p10, %p5875_p9 }
 0x936   : > { %3581 = vmatprep.subr.bf16.mxu0 %v5112_v15  ;;  %3624 = vmatprep.subr.bf16.mxu1 %v5114_v16  ;;  %v6601_v15 = vsub.s32 4, %v6062_v38 }
 0x937   : > { %p5871_p8 = pneg %p5870_p7 }
 0x938   : > { %5135 = vmatmul.mubr.msk.bf16.vlgmr.msra.gmra.mrb[44].mxu0 %vm868_vm5, %v6511_v53  ;;  %5136 = vmatmul.mubr.msk.bf16.vlgmr.msra.gmra.mrb[44].mxu1 %vm868_vm5, %v6511_v53 }
 0x939   : > { %3582 = vmatpush1.bf16.msra.mxu0 %v5111_v33  ;;  %3625 = vmatpush1.bf16.msra.mxu1 %v5113_v34  ;;  %p5878_p12 = pnand %p5877_p11, %p5871_p8 }
 0x93a   : > { %3583 = vmatprep.subr.bf16.mxu0 %v5128_v21  ;;  %3626 = vmatprep.subr.bf16.mxu1 %v5130_v13 }
 0x93b   : > { %3613 = vmatprep.mubr.bf16.mxu0 %v5919_v12  ;;  %3656 = vmatprep.mubr.bf16.mxu1 %v5919_v12  ;;  %v5702_v12 = vld [vmem:[%s6008_s14 + $0x8] sm:$0xff]  }
 0x93d   : > { %3584 = vmatpush1.bf16.msra.mxu0 %v5127_v61  ;;  %3627 = vmatpush1.bf16.msra.mxu1 %v5129_v62 }
 0x93e   : > { %5323 = vmatprep.subr.bf16.mxu0 %v5696_v22  ;;  %5345 = vmatprep.subr.bf16.mxu1 %v5697_v41 }
 0x940   : > { %5137 = vmatmul.mubr.msk.bf16.vlgmr.msra.gmra.mrb[48].mxu0 %vm868_vm5, %v6511_v53  ;;  %5138 = vmatmul.mubr.msk.bf16.vlgmr.msra.gmra.mrb[48].mxu1 %vm868_vm5, %v6511_v53  ;;  %v5713_v53 = vld [vmem:[%s6008_s14 + $0xe0] sm:$0xff]  }
 0x941   : > { %5324 = vmatpush3.bf16.msra.mxu0 %v5698_v23  ;;  %5346 = vmatpush3.bf16.msra.mxu1 %v5699_v24 }
 0x942   : > { %5325 = vmatprep.subr.bf16.mxu0 %v5700_v45  ;;  %5347 = vmatprep.subr.bf16.mxu1 %v5701_v27  ;;  %v3099_v27 = vrot.slane %v592_v5, %v6601_v15 }
 0x945   : > { %5326 = vmatpush3.bf16.msra.mxu0 %v5702_v12  ;;  %5348 = vmatpush3.bf16.msra.mxu1 %v5703_v56  ;;  %v3107_v12 = vrot.slane %v592_v5, %v6586_v2 }
 0x946   : > { %5327 = vmatprep.subr.bf16.mxu0 %v5704_v58  ;;  %5349 = vmatprep.subr.bf16.mxu1 %v5705_v26  ;;  %v3103_v26 = vrot.slane %v592_v5, %v6604_v18 }
 0x949   : > { %5328 = vmatpush3.bf16.msra.mxu0 %v5706_v48  ;;  %5350 = vmatpush3.bf16.msra.mxu1 %v5707_v47  ;;  %v3111_v48 = vrot.slane %v592_v5, %v3110_v19 }
 0x94a   : > { %5329 = vmatprep.subr.bf16.mxu0 %v5708_v28  ;;  %5351 = vmatprep.subr.bf16.mxu1 %v5709_v35 }
 0x94d   : > { %5330 = vmatpush3.bf16.msra.mxu0 %v5710_v36  ;;  %5352 = vmatpush3.bf16.msra.mxu1 %v5711_v29 }
 0x94e   : > { %5331 = vmatprep.subr.bf16.mxu0 %v5712_v30  ;;  %5353 = vmatprep.subr.bf16.mxu1 %v5713_v53 }
 0x951   : > { %5332 = vmatpush3.bf16.msra.mxu0 %v5714_v40  ;;  %5354 = vmatpush3.bf16.msra.mxu1 %v5715_v43 }
 0x952   : > { %5333 = vmatprep.subr.bf16.mxu0 %v5716_v49  ;;  %5355 = vmatprep.subr.bf16.mxu1 %v5717_v55 }
 0x955   : > { %5334 = vmatpush3.bf16.msra.mxu0 %v5718_v46  ;;  %5356 = vmatpush3.bf16.msra.mxu1 %v5719_v51 }
 0x956   : > { %5335 = vmatprep.subr.bf16.mxu0 %v5720_v54  ;;  %5357 = vmatprep.subr.bf16.mxu1 %v5721_v52  ;;  %v5730_v52 = vld [vmem:[%s6008_s14 + $0x100] sm:$0xff]  }
 0x959   : > { %5336 = vmatpush3.bf16.msra.mxu0 %v5722_v11  ;;  %5358 = vmatpush3.bf16.msra.mxu1 %v5723_v44  ;;  %v5731_v11 = vld [vmem:[%s6008_s14 + $0x180] sm:$0xff]  }
 0x95a   : > { %5337 = vmatprep.subr.bf16.mxu0 %v5724_v10  ;;  %5359 = vmatprep.subr.bf16.mxu1 %v5725_v42 }
 0x95d   : > { %5338 = vmatpush3.bf16.msra.mxu0 %v5726_v59  ;;  %5360 = vmatpush3.bf16.msra.mxu1 %v5727_v60  ;;  %v5732_v60 = vld [vmem:[%s6008_s14 + $0x148] sm:$0xff]  }
 0x95e   : > { %5367 = vmatprep.subr.bf16.mxu0 %v5728_v63  ;;  %5389 = vmatprep.subr.bf16.mxu1 %v5729_v1  ;;  %v5733_v63 = vld [vmem:[%s6008_s14 + $0x1c8] sm:$0xff]   ;;  %v3115_v1 = vrot.slane %v6589_v3, %v6065_v39  ;;  %v3119_v39 = vrot.slane %v6589_v3, %v6466_v25 }
 0x9fb   : > { %v3357_v16 = vpop.f32.mrb[36].mxu0  ;;  %v3400_v17 = vpop.f32.mrb[36].mxu1 }
 0x9fc   : > { %v3358_v20 = vadd.f32 %v3357_v16, %v3083_v6  ;;  %v3401_v33 = vadd.f32 %v3400_v17, %v3091_v8  ;;  %v3359_v34 = vpop.f32.mrb[37].mxu0  ;;  %v3402_v21 = vpop.f32.mrb[37].mxu1 }
 0x9fd   : > { %v3360_v13 = vadd.f32 %v3359_v34, %v3087_v9  ;;  %v3403_v61 = vadd.f32 %v3402_v21, %v3095_v14  ;;  %v3361_v62 = vpop.f32.mrb[38].mxu0  ;;  %v3404_v22 = vpop.f32.mrb[38].mxu1 }
 0x9fe   : > { %v3362_v41 = vadd.f32 %v3361_v62, %v3083_v6  ;;  %v3405_v23 = vadd.f32 %v3404_v22, %v3091_v8  ;;  %v3363_v24 = vpop.f32.mrb[39].mxu0  ;;  %v3406_v45 = vpop.f32.mrb[39].mxu1  ;;  %v3667_v47 = vmax.f32 %v3358_v20, 0.0  ;;  %v3669_v28 = vmax.f32 %v3401_v33, 0.0 }
 0x9ff   : > { %v3364_v56 = vadd.f32 %v3363_v24, %v3087_v9  ;;  %v3407_v58 = vadd.f32 %v3406_v45, %v3095_v14  ;;  %v3668_v29 = vmax.f32 %v3360_v13, 0.0  ;;  %v3670_v30 = vmax.f32 %v3403_v61, 0.0  ;;  %v5734_v13 = vld [vmem:[%s6008_s14 + $0x108] sm:$0xff]   ;;  %v5736_v24 = vld [vmem:[%s6008_s14 + $0x150] sm:$0xff]  }
 0xa00   : > { %v3683_v35 = vmax.f32 %v3362_v41, 0.0  ;;  %v3685_v36 = vmax.f32 %v3405_v23, 0.0  ;;  %v3123_v14 = vrot.slane %v6589_v3, %v6492_v57  ;;  %v5735_v61 = vld [vmem:[%s6008_s14 + $0x188] sm:$0xff]   ;;  %v3127_v57 = vrot.slane %v6589_v3, %v6497_v50  ;;  %v5737_v45 = vld [vmem:[%s6008_s14 + $0x1d0] sm:$0xff]  }
 0xa01   : > { %v3684_v53 = vmax.f32 %v3364_v56, 0.0  ;;  %v3686_v40 = vmax.f32 %v3407_v58, 0.0 }
 0xa02   : > { %v3699_v43 = vpack.c.bf16 %v3683_v35, %v3667_v47  ;;  %v3701_v49 = vpack.c.bf16 %v3685_v36, %v3669_v28  ;;  %v5738_v35 = vld [vmem:[%s6008_s14 + $0x110] sm:$0xff]  }
 0xa03   : > { %v3700_v55 = vpack.c.bf16 %v3684_v53, %v3668_v29  ;;  %v3702_v46 = vpack.c.bf16 %v3686_v40, %v3670_v30  ;;  %v3443_v51 = vpop.f32.mrb[40].mxu0  ;;  %v3486_v54 = vpop.f32.mrb[40].mxu1  ;;  %v5739_v36 = vld [vmem:[%s6008_s14 + $0x190] sm:$0xff]  }
 0xa04   : > { %v3444_v44 = vadd.f32 %v3443_v51, %v3099_v27  ;;  %v3487_v10 = vadd.f32 %v3486_v54, %v3107_v12  ;;  %v3445_v42 = vpop.f32.mrb[41].mxu0  ;;  %v3488_v59 = vpop.f32.mrb[41].mxu1 }
 0xa05   : > { %v3446_v5 = vadd.f32 %v3445_v42, %v3103_v26  ;;  %v3489_v6 = vadd.f32 %v3488_v59, %v3111_v48  ;;  %v3447_v8 = vpop.f32.mrb[42].mxu0  ;;  %v3490_v9 = vpop.f32.mrb[42].mxu1  ;;  %4519 = vmatprep.mubr.bf16.mxu0 %v3700_v55  ;;  %4560 = vmatprep.mubr.bf16.mxu1 %v3702_v46  ;;  %v3131_v42 = vrot.slane %v6589_v3, %v6601_v15 }
 0xa06   : > { %v3448_v16 = vadd.f32 %v3447_v8, %v3099_v27  ;;  %v3491_v17 = vadd.f32 %v3490_v9, %v3107_v12  ;;  %v3449_v20 = vpop.f32.mrb[43].mxu0  ;;  %v3492_v33 = vpop.f32.mrb[43].mxu1  ;;  %4520 = vmatmul.mubr.bf16.vlgmr.msra.gmra.mrb[52].mxu0 %v3699_v43  ;;  %4561 = vmatmul.mubr.bf16.vlgmr.msra.gmra.mrb[52].mxu1 %v3701_v49  ;;  %v3671_v62 = vmax.f32 %v3444_v44, 0.0  ;;  %v3673_v22 = vmax.f32 %v3487_v10, 0.0  ;;  %v5740_v43 = vld [vmem:[%s6008_s14 + $0x158] sm:$0xff]  }
 0xa07   : > { %v3450_v34 = vadd.f32 %v3449_v20, %v3103_v26  ;;  %v3493_v21 = vadd.f32 %v3492_v33, %v3111_v48  ;;  %5368 = vmatpush3.bf16.msra.mxu0 %v5730_v52  ;;  %5390 = vmatpush3.bf16.msra.mxu1 %v5731_v11  ;;  %v3672_v25 = vmax.f32 %v3446_v5, 0.0  ;;  %v3674_v27 = vmax.f32 %v3489_v6, 0.0  ;;  %v5741_v49 = vld [vmem:[%s6008_s14 + $0x1d8] sm:$0xff]   ;;  %v5745_v20 = vld [vmem:[%s6008_s14 + $0x1e0] sm:$0xff]  }
 0xa08   : > { %v3687_v41 = vmax.f32 %v3448_v16, 0.0  ;;  %v3689_v23 = vmax.f32 %v3491_v17, 0.0  ;;  %5369 = vmatprep.subr.bf16.mxu0 %v5732_v60  ;;  %5391 = vmatprep.subr.bf16.mxu1 %v5733_v63  ;;  %v3135_v59 = vrot.slane %v6589_v3, %v6604_v18  ;;  %v5742_v5 = vld [vmem:[%s6008_s14 + $0x118] sm:$0xff]   ;;  %v5744_v17 = vld [vmem:[%s6008_s14 + $0x160] sm:$0xff]  }
 0xa09   : > { %v3688_v12 = vmax.f32 %v3450_v34, 0.0  ;;  %v3690_v56 = vmax.f32 %v3493_v21, 0.0  ;;  %v5743_v6 = vld [vmem:[%s6008_s14 + $0x198] sm:$0xff]  }
 0xa0a   : > { %v6628_v58 = vpack.c.bf16 %v3687_v41, %v3671_v62  ;;  %v6630_v26 = vpack.c.bf16 %v3689_v23, %v3673_v22  ;;  %v5746_v62 = vld [vmem:[%s6008_s14 + $0x120] sm:$0xff]  }
 0xa0b   : > { %v3704_v50 = vpack.c.bf16 %v3688_v12, %v3672_v25  ;;  %v3706_v48 = vpack.c.bf16 %v3690_v56, %v3674_v27  ;;  %5370 = vmatpush3.bf16.msra.mxu0 %v5734_v13  ;;  %5392 = vmatpush3.bf16.msra.mxu1 %v5735_v61  ;;  %v3529_v47 = vpop.f32.mrb[44].mxu0  ;;  %v3572_v28 = vpop.f32.mrb[44].mxu1  ;;  %v5747_v22 = vld [vmem:[%s6008_s14 + $0x1a0] sm:$0xff]   ;;  %v5748_v25 = vld [vmem:[%s6008_s14 + $0x168] sm:$0xff]  }
 0xa0c   : > { %v3530_v29 = vadd.f32 %v3529_v47, %v3115_v1  ;;  %v3573_v30 = vadd.f32 %v3572_v28, %v3123_v14  ;;  %v3531_v53 = vpop.f32.mrb[45].mxu0  ;;  %v3574_v40 = vpop.f32.mrb[45].mxu1  ;;  %5371 = vmatprep.subr.bf16.mxu0 %v5736_v24  ;;  %5393 = vmatprep.subr.bf16.mxu1 %v5737_v45  ;;  %v5749_v27 = vld [vmem:[%s6008_s14 + $0x1e8] sm:$0xff]  }
 0xa0d   : > { %v3532_v55 = vadd.f32 %v3531_v53, %v3119_v39  ;;  %v3575_v46 = vadd.f32 %v3574_v40, %v3127_v57  ;;  %v3533_v51 = vpop.f32.mrb[46].mxu0  ;;  %v3576_v54 = vpop.f32.mrb[46].mxu1  ;;  %4601 = vmatprep.mubr.bf16.mxu0 %v3704_v50  ;;  %4642 = vmatprep.mubr.bf16.mxu1 %v3706_v48  ;;  %v5750_v53 = vld [vmem:[%s6008_s14 + $0x128] sm:$0xff]  }
 0xa0e   : > { %v3534_v52 = vadd.f32 %v3533_v51, %v3115_v1  ;;  %v3577_v11 = vadd.f32 %v3576_v54, %v3123_v14  ;;  %v3535_v44 = vpop.f32.mrb[47].mxu0  ;;  %v3578_v10 = vpop.f32.mrb[47].mxu1  ;;  %v3143_v1 = vrot.slane %v6589_v3, %v3110_v19  ;;  %v3675_v8 = vmax.f32 %v3530_v29, 0.0  ;;  %v5751_v40 = vld [vmem:[%s6008_s14 + $0x1a8] sm:$0xff]   ;;  %v5752_v51 = vld [vmem:[%s6008_s14 + $0x170] sm:$0xff]  }
 0xa0f   : > { %v3536_v60 = vadd.f32 %v3535_v44, %v3119_v39  ;;  %v3579_v63 = vadd.f32 %v3578_v10, %v3127_v57  ;;  %5372 = vmatpush3.bf16.msra.mxu0 %v5738_v35  ;;  %5394 = vmatpush3.bf16.msra.mxu1 %v5739_v36  ;;  %v3677_v9 = vmax.f32 %v3573_v30, 0.0  ;;  %v3676_v33 = vmax.f32 %v3532_v55, 0.0 }
 0xa10   : > { %v3691_v14 = vmax.f32 %v3534_v52, 0.0  ;;  %v3693_v16 = vmax.f32 %v3577_v11, 0.0  ;;  %5373 = vmatprep.subr.bf16.mxu0 %v5740_v43  ;;  %5395 = vmatprep.subr.bf16.mxu1 %v5741_v49  ;;  %v3678_v39 = vmax.f32 %v3575_v46, 0.0 }
 0xa11   : > { %v3692_v34 = vmax.f32 %v3536_v60, 0.0  ;;  %v3694_v21 = vmax.f32 %v3579_v63, 0.0  ;;  %v5754_v63 = vld [vmem:[%s6008_s14 + $0x130] sm:$0xff]  }
 0xa12   : > { %v6647_v13 = vpack.c.bf16 %v3691_v14, %v3675_v8  ;;  %v6649_v38 = vpack.c.bf16 %v3693_v16, %v3677_v9  ;;  %v5758_v8 = vld [vmem:[%s6008_s14 + $0x138] sm:$0xff]   ;;  %v5760_v14 = vld [vmem:[%s6008_s14 + $0x240] sm:$0xff]  }
 0xa13   : > { %v6651_v3 = vpack.c.bf16 %v3692_v34, %v3676_v33  ;;  %v6653_v19 = vpack.c.bf16 %v3694_v21, %v3678_v39  ;;  %5374 = vmatpush3.bf16.msra.mxu0 %v5742_v5  ;;  %5396 = vmatpush3.bf16.msra.mxu1 %v5743_v6  ;;  %v3615_v61 = vpop.f32.mrb[48].mxu0  ;;  %v3658_v57 = vpop.f32.mrb[48].mxu1  ;;  %v5755_v5 = vld [vmem:[%s6008_s14 + $0x1b0] sm:$0xff]   ;;  %v5756_v6 = vld [vmem:[%s6008_s14 + $0x178] sm:$0xff]   ;;  %v5761_v16 = vld [vmem:[%s6008_s14 + $0x2c0] sm:$0xff]  }
 0xa14   : > { %v3616_v41 = vadd.f32 %v3615_v61, %v3131_v42  ;;  %v3659_v23 = vadd.f32 %v3658_v57, %v6593_v4  ;;  %v3617_v24 = vpop.f32.mrb[49].mxu0  ;;  %v3660_v45 = vpop.f32.mrb[49].mxu1  ;;  %5375 = vmatprep.subr.bf16.mxu0 %v5744_v17  ;;  %5397 = vmatprep.subr.bf16.mxu1 %v5745_v20  ;;  %v5759_v9 = vld [vmem:[%s6008_s14 + $0x1b8] sm:$0xff]   ;;  %v5762_v17 = vld [vmem:[%s6008_s14 + $0x200] sm:$0xff]   ;;  %v5764_v33 = vld [vmem:[%s6008_s14 + $0x248] sm:$0xff]  }
 0xa15   : > { %v3618_v12 = vadd.f32 %v3617_v24, %v3135_v59  ;;  %v3661_v56 = vadd.f32 %v3660_v45, %v3143_v1  ;;  %v3619_v50 = vpop.f32.mrb[50].mxu0  ;;  %v3662_v48 = vpop.f32.mrb[50].mxu1  ;;  %v5763_v20 = vld [vmem:[%s6008_s14 + $0x280] sm:$0xff]   ;;  %v5765_v39 = vld [vmem:[%s6008_s14 + $0x2c8] sm:$0xff]   ;;  %v5768_v61 = vld [vmem:[%s6008_s14 + $0x250] sm:$0xff]  }
 0xa16   : > { %v3620_v47 = vadd.f32 %v3619_v50, %v3131_v42  ;;  %v3663_v28 = vadd.f32 %v3662_v48, %v6593_v4  ;;  %v3621_v35 = vpop.f32.mrb[51].mxu0  ;;  %v3664_v36 = vpop.f32.mrb[51].mxu1  ;;  %v3679_v43 = vmax.f32 %v3616_v41, 0.0  ;;  %v3681_v49 = vmax.f32 %v3659_v23, 0.0  ;;  %v5753_v4 = vld [vmem:[%s6008_s14 + $0x1f0] sm:$0xff]   ;;  %v5766_v34 = vld [vmem:[%s6008_s14 + $0x208] sm:$0xff]  }
 0xa17   : > { %v3622_v29 = vadd.f32 %v3621_v35, %v3135_v59  ;;  %v3665_v30 = vadd.f32 %v3664_v36, %v3143_v1  ;;  %5376 = vmatpush3.bf16.msra.mxu0 %v5746_v62  ;;  %5398 = vmatpush3.bf16.msra.mxu1 %v5747_v22  ;;  %v3680_v54 = vmax.f32 %v3618_v12, 0.0  ;;  %v3682_v52 = vmax.f32 %v3661_v56, 0.0  ;;  %v5757_v1 = vld [vmem:[%s6008_s14 + $0x1f8] sm:$0xff]   ;;  %v5767_v21 = vld [vmem:[%s6008_s14 + $0x288] sm:$0xff]   ;;  %v5776_v41 = vld [vmem:[%s6008_s14 + $0x260] sm:$0xff]  }
 0xa18   : > { %v3695_v55 = vmax.f32 %v3620_v47, 0.0  ;;  %v3697_v46 = vmax.f32 %v3663_v28, 0.0  ;;  %5377 = vmatprep.subr.bf16.mxu0 %v5748_v25  ;;  %5399 = vmatprep.subr.bf16.mxu1 %v5749_v27  ;;  %v5772_v57 = vld [vmem:[%s6008_s14 + $0x258] sm:$0xff]   ;;  %v5777_v23 = vld [vmem:[%s6008_s14 + $0x2e0] sm:$0xff]   ;;  %v5780_v25 = vld [vmem:[%s6008_s14 + $0x268] sm:$0xff]  }
 0xa19   : > { %v3696_v11 = vmax.f32 %v3622_v29, 0.0  ;;  %v3698_v44 = vmax.f32 %v3665_v30, 0.0  ;;  %v5773_v62 = vld [vmem:[%s6008_s14 + $0x2d8] sm:$0xff]   ;;  %v5778_v24 = vld [vmem:[%s6008_s14 + $0x220] sm:$0xff]   ;;  %v5781_v27 = vld [vmem:[%s6008_s14 + $0x2e8] sm:$0xff]  }
 0xa1a   : > { %v6665_v10 = vpack.c.bf16 %v3695_v55, %v3679_v43  ;;  %v6667_v42 = vpack.c.bf16 %v3697_v46, %v3681_v49  ;;  %v5775_v22 = vld [vmem:[%s6008_s14 + $0x298] sm:$0xff]   ;;  %v5779_v45 = vld [vmem:[%s6008_s14 + $0x2a0] sm:$0xff]   ;;  %v5782_v12 = vld [vmem:[%s6008_s14 + $0x228] sm:$0xff]  }
 0xa1b   : > { %v6669_v59 = vpack.c.bf16 %v3696_v11, %v3680_v54  ;;  %v6671_v60 = vpack.c.bf16 %v3698_v44, %v3682_v52  ;;  %5378 = vmatpush3.bf16.msra.mxu0 %v5750_v53  ;;  %5400 = vmatpush3.bf16.msra.mxu1 %v5751_v40  ;;  %v5783_v56 = vld [vmem:[%s6008_s14 + $0x2a8] sm:$0xff]   ;;  %v5784_v50 = vld [vmem:[%s6008_s14 + $0x270] sm:$0xff]   ;;  %v5788_v35 = vld [vmem:[%s6008_s14 + $0x278] sm:$0xff]  }
 0xa1c   : > { %5379 = vmatprep.subr.bf16.mxu0 %v5752_v51  ;;  %5401 = vmatprep.subr.bf16.mxu1 %v5753_v4  ;;  %v5785_v48 = vld [vmem:[%s6008_s14 + $0x2f0] sm:$0xff]   ;;  %v5789_v36 = vld [vmem:[%s6008_s14 + $0x2f8] sm:$0xff]   ;;  %v5792_v53 = vld [vmem:[%s6008_s14 + $0x340] sm:$0xff]  }
 0xa1d   : > { %v5786_v47 = vld [vmem:[%s6008_s14 + $0x230] sm:$0xff]   ;;  %v5790_v29 = vld [vmem:[%s6008_s14 + $0x238] sm:$0xff]   ;;  %v5793_v40 = vld [vmem:[%s6008_s14 + $0x3c0] sm:$0xff]  }
 0xa1e   : > { %v5787_v28 = vld [vmem:[%s6008_s14 + $0x2b0] sm:$0xff]   ;;  %v5791_v30 = vld [vmem:[%s6008_s14 + $0x2b8] sm:$0xff]   ;;  %v5794_v43 = vld [vmem:[%s6008_s14 + $0x300] sm:$0xff]  }
 0xa1f   : > { %5380 = vmatpush3.bf16.msra.mxu0 %v5754_v63  ;;  %5402 = vmatpush3.bf16.msra.mxu1 %v5755_v5  ;;  %v5795_v49 = vld [vmem:[%s6008_s14 + $0x380] sm:$0xff]   ;;  %v5796_v55 = vld [vmem:[%s6008_s14 + $0x348] sm:$0xff]   ;;  %v5800_v54 = vld [vmem:[%s6008_s14 + $0x350] sm:$0xff]  }
 0xa20   : > { %5381 = vmatprep.subr.bf16.mxu0 %v5756_v6  ;;  %5403 = vmatprep.subr.bf16.mxu1 %v5757_v1  ;;  %v5797_v46 = vld [vmem:[%s6008_s14 + $0x3c8] sm:$0xff]   ;;  %v5803_v52 = vld [vmem:[%s6008_s14 + $0x390] sm:$0xff]   ;;  %v5804_v11 = vld [vmem:[%s6008_s14 + $0x358] sm:$0xff]  }
 0xa21   : > { %v5798_v51 = vld [vmem:[%s6008_s14 + $0x308] sm:$0xff]   ;;  %v5805_v44 = vld [vmem:[%s6008_s14 + $0x3d8] sm:$0xff]   ;;  %v5808_v63 = vld [vmem:[%s6008_s14 + $0x360] sm:$0xff]  }
 0xa22   : > { %v5799_v4 = vld [vmem:[%s6008_s14 + $0x388] sm:$0xff]   ;;  %v5809_v5 = vld [vmem:[%s6008_s14 + $0x3e0] sm:$0xff]  }
 0xa23   : > { %5382 = vmatpush3.bf16.msra.mxu0 %v5758_v8  ;;  %5404 = vmatpush3.bf16.msra.mxu1 %v5759_v9  ;;  %v5810_v6 = vld [vmem:[%s6008_s14 + $0x320] sm:$0xff]   ;;  %v5812_v8 = vld [vmem:[%s6008_s14 + $0x368] sm:$0xff]  }
 0xa24   : > { %5411 = vmatprep.subr.bf16.mxu0 %v5760_v14  ;;  %5433 = vmatprep.subr.bf16.mxu1 %v5761_v16  ;;  %v5811_v1 = vld [vmem:[%s6008_s14 + $0x3a0] sm:$0xff]   ;;  %v5813_v9 = vld [vmem:[%s6008_s14 + $0x3e8] sm:$0xff]  }
 0xa25   : > { %v5814_v14 = vld [vmem:[%s6008_s14 + $0x328] sm:$0xff]  }
 0xa26   : > { %4602 = vmatmul.mubr.bf16.vlgmr.msra.gmra.mrb[56].mxu0 %v6628_v58  ;;  %4643 = vmatmul.mubr.bf16.vlgmr.msra.gmra.mrb[56].mxu1 %v6630_v26  ;;  %v5769_v58 = vld [vmem:[%s6008_s14 + $0x2d0] sm:$0xff]   ;;  %v5815_v16 = vld [vmem:[%s6008_s14 + $0x3a8] sm:$0xff]  }
 0xa27   : > { %5412 = vmatpush3.bf16.msra.mxu0 %v5762_v17  ;;  %4683 = vmatprep.mubr.bf16.mxu0 %v6651_v3  ;;  %v5770_v26 = vld [vmem:[%s6008_s14 + $0x210] sm:$0xff]  }
 0xa28   : > { %5434 = vmatpush3.bf16.msra.mxu1 %v5763_v20  ;;  %4724 = vmatprep.mubr.bf16.mxu1 %v6653_v19  ;;  %v5771_v3 = vld [vmem:[%s6008_s14 + $0x290] sm:$0xff]   ;;  %v5774_v19 = vld [vmem:[%s6008_s14 + $0x218] sm:$0xff]  }
 0xa29   : > { %5413 = vmatprep.subr.bf16.mxu0 %v5764_v33  ;;  %5435 = vmatprep.subr.bf16.mxu1 %v5765_v39  ;;  %v5816_v17 = vld [vmem:[%s6008_s14 + $0x370] sm:$0xff]  }
 0xa2a   : > { %v5817_v20 = vld [vmem:[%s6008_s14 + $0x3f0] sm:$0xff]  }
 0xa2b   : > { %5414 = vmatpush3.bf16.msra.mxu0 %v5766_v34  ;;  %v5818_v33 = vld [vmem:[%s6008_s14 + $0x330] sm:$0xff]   ;;  %v5820_v34 = vld [vmem:[%s6008_s14 + $0x378] sm:$0xff]  }
 0xa2c   : > { %5436 = vmatpush3.bf16.msra.mxu1 %v5767_v21  ;;  %5415 = vmatprep.subr.bf16.mxu0 %v5768_v61  ;;  %v5819_v39 = vld [vmem:[%s6008_s14 + $0x3b0] sm:$0xff]   ;;  %v5821_v21 = vld [vmem:[%s6008_s14 + $0x3f8] sm:$0xff]  }
 0xa2d   : > { %5437 = vmatprep.subr.bf16.mxu1 %v5769_v58  ;;  %v5822_v61 = vld [vmem:[%s6008_s14 + $0x338] sm:$0xff]  }
 0xa2e   : > { %v5823_v58 = vld [vmem:[%s6008_s14 + $0x3b8] sm:$0xff]  }
 0xa2f   : > { %5416 = vmatpush3.bf16.msra.mxu0 %v5770_v26 }
 0xa30   : > { %5438 = vmatpush3.bf16.msra.mxu1 %v5771_v3  ;;  %5417 = vmatprep.subr.bf16.mxu0 %v5772_v57  ;;  %v6754_v57 = vld [vmem:[%s6013_s18] sm:$0xff] }
 0xa31   : > { %5439 = vmatprep.subr.bf16.mxu1 %v5773_v62  ;;  %v3718_v62 = vrot.slane %v6754_v57, %v6601_v15 }
 0xa33   : > { %5418 = vmatpush3.bf16.msra.mxu0 %v5774_v19 }
 0xa34   : > { %5440 = vmatpush3.bf16.msra.mxu1 %v5775_v22  ;;  %5419 = vmatprep.subr.bf16.mxu0 %v5776_v41 }
 0xa35   : > { %5441 = vmatprep.subr.bf16.mxu1 %v5777_v23 }
 0xa37   : > { %5420 = vmatpush3.bf16.msra.mxu0 %v5778_v24 }
 0xa38   : > { %5442 = vmatpush3.bf16.msra.mxu1 %v5779_v45  ;;  %5421 = vmatprep.subr.bf16.mxu0 %v5780_v25 }
 0xa39   : > { %5443 = vmatprep.subr.bf16.mxu1 %v5781_v27 }
 0xa3b   : > { %5422 = vmatpush3.bf16.msra.mxu0 %v5782_v12 }
 0xa3c   : > { %5444 = vmatpush3.bf16.msra.mxu1 %v5783_v56  ;;  %5423 = vmatprep.subr.bf16.mxu0 %v5784_v50 }
 0xa3d   : > { %5445 = vmatprep.subr.bf16.mxu1 %v5785_v48 }
 0xa3f   : > { %5424 = vmatpush3.bf16.msra.mxu0 %v5786_v47 }
 0xa40   : > { %5446 = vmatpush3.bf16.msra.mxu1 %v5787_v28  ;;  %5425 = vmatprep.subr.bf16.mxu0 %v5788_v35 }
 0xa41   : > { %5447 = vmatprep.subr.bf16.mxu1 %v5789_v36 }
 0xa43   : > { %5426 = vmatpush3.bf16.msra.mxu0 %v5790_v29 }
 0xa44   : > { %5448 = vmatpush3.bf16.msra.mxu1 %v5791_v30  ;;  %5455 = vmatprep.subr.bf16.mxu0 %v5792_v53 }
 0xa45   : > { %5477 = vmatprep.subr.bf16.mxu1 %v5793_v40 }
 0xa46   : > { %4684 = vmatmul.mubr.bf16.vlgmr.msra.gmra.mrb[60].mxu0 %v6647_v13  ;;  %v5801_v13 = vld [vmem:[%s6008_s14 + $0x3d0] sm:$0xff]  }
 0xa47   : > { %4725 = vmatmul.mubr.bf16.vlgmr.msra.gmra.mrb[60].mxu1 %v6649_v38  ;;  %5456 = vmatpush3.bf16.msra.mxu0 %v5794_v43  ;;  %v5802_v38 = vld [vmem:[%s6008_s14 + $0x310] sm:$0xff]  }
 0xa48   : > { %4765 = vmatprep.mubr.bf16.mxu0 %v6669_v59  ;;  %5478 = vmatpush3.bf16.msra.mxu1 %v5795_v49  ;;  %v5806_v59 = vld [vmem:[%s6008_s14 + $0x318] sm:$0xff]  }
 0xa49   : > { %4806 = vmatprep.mubr.bf16.mxu1 %v6671_v60  ;;  %5457 = vmatprep.subr.bf16.mxu0 %v5796_v55  ;;  %v5807_v60 = vld [vmem:[%s6008_s14 + $0x398] sm:$0xff]  }
 0xa4a   : > { %5479 = vmatprep.subr.bf16.mxu1 %v5797_v46 }
 0xa4b   : > { %5458 = vmatpush3.bf16.msra.mxu0 %v5798_v51 }
 0xa4c   : > { %5480 = vmatpush3.bf16.msra.mxu1 %v5799_v4  ;;  %5459 = vmatprep.subr.bf16.mxu0 %v5800_v54 }
 0xa4d   : > { %5481 = vmatprep.subr.bf16.mxu1 %v5801_v13 }
 0xa4f   : > { %5460 = vmatpush3.bf16.msra.mxu0 %v5802_v38 }
 0xa50   : > { %5482 = vmatpush3.bf16.msra.mxu1 %v5803_v52  ;;  %5461 = vmatprep.subr.bf16.mxu0 %v5804_v11 }
 0xa51   : > { %5483 = vmatprep.subr.bf16.mxu1 %v5805_v44 }
 0xa53   : > { %5462 = vmatpush3.bf16.msra.mxu0 %v5806_v59 }
 0xa54   : > { %5484 = vmatpush3.bf16.msra.mxu1 %v5807_v60  ;;  %5463 = vmatprep.subr.bf16.mxu0 %v5808_v63 }
 0xa55   : > { %5485 = vmatprep.subr.bf16.mxu1 %v5809_v5 }
 0xa57   : > { %5464 = vmatpush3.bf16.msra.mxu0 %v5810_v6 }
 0xa58   : > { %5486 = vmatpush3.bf16.msra.mxu1 %v5811_v1  ;;  %5465 = vmatprep.subr.bf16.mxu0 %v5812_v8 }
 0xa59   : > { %5487 = vmatprep.subr.bf16.mxu1 %v5813_v9 }
 0xa5b   : > { %5466 = vmatpush3.bf16.msra.mxu0 %v5814_v14 }
 0xa5c   : > { %5488 = vmatpush3.bf16.msra.mxu1 %v5815_v16  ;;  %5467 = vmatprep.subr.bf16.mxu0 %v5816_v17 }
 0xa5d   : > { %5489 = vmatprep.subr.bf16.mxu1 %v5817_v20 }
 0xa5f   : > { %5468 = vmatpush3.bf16.msra.mxu0 %v5818_v33 }
 0xa60   : > { %5490 = vmatpush3.bf16.msra.mxu1 %v5819_v39  ;;  %5469 = vmatprep.subr.bf16.mxu0 %v5820_v34 }
 0xa61   : > { %5491 = vmatprep.subr.bf16.mxu1 %v5821_v21 }
 0xa63   : > { %5470 = vmatpush3.bf16.msra.mxu0 %v5822_v61 }
 0xa64   : > { %5492 = vmatpush3.bf16.msra.mxu1 %v5823_v58 }
 0xa66   : > { %4766 = vmatmul.mubr.bf16.vlgmr.msra.gmra.mrb[64].mxu0 %v6665_v10 }
 0xa67   : > { %4807 = vmatmul.mubr.bf16.vlgmr.msra.gmra.mrb[64].mxu1 %v6667_v42 }
 0xad9   : > { %v5339_v26 = vpop.f32.mrb[52].mxu0  ;;  %v5361_v3 = vpop.f32.mrb[52].mxu1 }
 0xada   : > { %v5340_v19 = vpop.f32.mrb[53].mxu0  ;;  %v5362_v22 = vpop.f32.mrb[53].mxu1 }
 0xadb   : > { %v5341_v41 = vadd.f32 %v5340_v19, %v5339_v26  ;;  %v5363_v23 = vadd.f32 %v5362_v22, %v5361_v3  ;;  %v5342_v24 = vpop.f32.mrb[54].mxu0  ;;  %v5364_v45 = vpop.f32.mrb[54].mxu1 }
 0xadc   : > { %v5343_v25 = vpop.f32.mrb[55].mxu0  ;;  %v5365_v27 = vpop.f32.mrb[55].mxu1 }
 0xadd   : > { %v4522_v12 = vadd.f32 %v5341_v41, %v3718_v62  ;;  %v5344_v56 = vadd.f32 %v5343_v25, %v5342_v24  ;;  %v5366_v10 = vadd.f32 %v5365_v27, %v5364_v45 }
 0xadf   : > { %v4563_v50 = vadd.f32 %v5363_v23, %v4522_v12  ;;  %v4525_v42 = vadd.f32 %v5344_v56, %v3718_v62 }
 0xae1   : > { %v4566_v48 = vadd.f32 %v5366_v10, %v4525_v42 }
 0xaf9   : > { %v5383_v47 = vpop.f32.mrb[56].mxu0  ;;  %v5405_v28 = vpop.f32.mrb[56].mxu1 }
 0xafa   : > { %v5384_v35 = vpop.f32.mrb[57].mxu0  ;;  %v5406_v36 = vpop.f32.mrb[57].mxu1 }
 0xafb   : > { %v5385_v29 = vadd.f32 %v5384_v35, %v5383_v47  ;;  %v5407_v15 = vadd.f32 %v5406_v36, %v5405_v28  ;;  %v5386_v30 = vpop.f32.mrb[58].mxu0  ;;  %v5408_v53 = vpop.f32.mrb[58].mxu1 }
 0xafc   : > { %v5387_v40 = vpop.f32.mrb[59].mxu0  ;;  %v5409_v43 = vpop.f32.mrb[59].mxu1 }
 0xafd   : > { %v4604_v49 = vadd.f32 %v5385_v29, %v4563_v50  ;;  %v5388_v55 = vadd.f32 %v5387_v40, %v5386_v30  ;;  %v5410_v46 = vadd.f32 %v5409_v43, %v5408_v53 }
 0xaff   : > { %v4645_v51 = vadd.f32 %v5407_v15, %v4604_v49  ;;  %v4607_v4 = vadd.f32 %v5388_v55, %v4566_v48  ;;  %v4846_v49 = vrot.slane %v6754_v57, %v6604_v18 }
 0xb01   : > { %v4648_v54 = vadd.f32 %v5410_v46, %v4607_v4  ;;  %v4852_v46 = vrot.slane %v6754_v57, %v6586_v2 }
 0xb19   : > { %v5427_v13 = vpop.f32.mrb[60].mxu0 }
 0xb1a   : > { %v5449_v38 = vpop.f32.mrb[60].mxu1  ;;  %v5428_v52 = vpop.f32.mrb[61].mxu0 }
 0xb1b   : > { %v5429_v11 = vadd.f32 %v5428_v52, %v5427_v13  ;;  %v5450_v44 = vpop.f32.mrb[61].mxu1  ;;  %v5430_v59 = vpop.f32.mrb[62].mxu0 }
 0xb1c   : > { %v5451_v60 = vadd.f32 %v5450_v44, %v5449_v38  ;;  %v5452_v63 = vpop.f32.mrb[62].mxu1  ;;  %v5431_v5 = vpop.f32.mrb[63].mxu0 }
 0xb1d   : > { %v4686_v6 = vadd.f32 %v5429_v11, %v4645_v51  ;;  %v5432_v1 = vadd.f32 %v5431_v5, %v5430_v59  ;;  %v5453_v8 = vpop.f32.mrb[63].mxu1 }
 0xb1e   : > { %v5454_v9 = vadd.f32 %v5453_v8, %v5452_v63 }
 0xb1f   : > { %v4727_v14 = vadd.f32 %v5451_v60, %v4686_v6  ;;  %v4689_v16 = vadd.f32 %v5432_v1, %v4648_v54 }
 0xb21   : > { %v4730_v17 = vadd.f32 %v5454_v9, %v4689_v16 }
 0xb39   : > { %v5471_v20 = vpop.f32.mrb[64].mxu0 }
 0xb3a   : > { %v5493_v33 = vpop.f32.mrb[64].mxu1  ;;  %v5472_v39 = vpop.f32.mrb[65].mxu0 }
 0xb3b   : > { %v5473_v34 = vadd.f32 %v5472_v39, %v5471_v20  ;;  %v5494_v21 = vpop.f32.mrb[65].mxu1  ;;  %v5474_v61 = vpop.f32.mrb[66].mxu0 }
 0xb3c   : > { %v5495_v58 = vadd.f32 %v5494_v21, %v5493_v33  ;;  %v5496_v26 = vpop.f32.mrb[66].mxu1  ;;  %v5475_v3 = vpop.f32.mrb[67].mxu0 }
 0xb3d   : > { %v4768_v62 = vadd.f32 %v5473_v34, %v4727_v14  ;;  %v5476_v19 = vadd.f32 %v5475_v3, %v5474_v61  ;;  %v5497_v22 = vpop.f32.mrb[67].mxu1 }
 0xb3e   : > { %v5498_v41 = vadd.f32 %v5497_v22, %v5496_v26 }
 0xb3f   : > { %v4809_v23 = vadd.f32 %v5495_v58, %v4768_v62  ;;  %v4771_v24 = vadd.f32 %v5476_v19, %v4730_v17 }
 0xb41   : > { %v4812_v45 = vadd.f32 %v5498_v41, %v4771_v24  ;;  %v4815_v25 = vadd.f32 %v4809_v23, %v6505_v31 }
 0xb43   : > { %v4817_v27 = vsel %vm868_vm5, %v4815_v25, 0.0  ;;  %v4816_v12 = vadd.f32 %v4812_v45, %v6507_v37 }
 0xb44   : > { %4818 = vadd.xlane.f32.xlu0 %v4817_v27 }
 0xb45   : > { %v4820_v56 = vsel %vm868_vm5, %v4816_v12, 0.0 }
 0xb46   : > { %4821 = vadd.xlane.f32.xlu1 %v4820_v56 }
 0xbd1   : > { %v4819_v10 = vpop.xlane.xlu0 %4818 }
 0xbd2   : > { %v4823_v50 = vmul.f32 0.03125, %v4819_v10 }
 0xbd3   : > { %v4822_v42 = vpop.xlane.xlu1 %4821 }
 0xbd4   : > { %v4825_v48 = vsub.f32 %v4815_v25, %v4823_v50  ;;  %v4824_v47 = vmul.f32 0.03125, %v4822_v42 }
 0xbd6   : > { %v4826_v28 = vsub.f32 %v4816_v12, %v4824_v47  ;;  %v4827_v35 = vmul.f32 %v4825_v48, %v4825_v48 }
 0xbd8   : > { %v4829_v36 = vsel %vm868_vm5, %v4827_v35, 0.0  ;;  %v4828_v29 = vmul.f32 %v4826_v28, %v4826_v28 }
 0xbd9   : > { %4830 = vadd.xlane.f32.xlu0 %v4829_v36 }
 0xbda   : > { %v4832_v31 = vsel %vm868_vm5, %v4828_v29, 0.0 }
 0xbdb   : > { %4833 = vadd.xlane.f32.xlu1 %v4832_v31 }
 0xc66   : > { %v4831_v15 = vpop.xlane.xlu0 %4830 }
 0xc67   : > { %v4835_v37 = vmul.f32 0.03125, %v4831_v15 }
 0xc68   : > { %v4834_v30 = vpop.xlane.xlu1 %4833 }
 0xc69   : > { %v4837_v53 = vadd.f32 1e-05, %v4835_v37  ;;  %v4836_v40 = vmul.f32 0.03125, %v4834_v30 }
 0xc6b   : > { %5860 = vrsqrt.f32 %v4837_v53  ;;  %v4838_v43 = vadd.f32 1e-05, %v4836_v40 }
 0xc6d   : > { %5862 = vrsqrt.f32 %v4838_v43 }
 0xc75   : > { %v5861_v55 = vpop.eup %5860 }
 0xc76   : > { %v4841_v51 = vmul.f32 %v5861_v55, %v4825_v48 }
 0xc77   : > { %v5863_v4 = vpop.eup %5862 }
 0xc78   : > { %v4847_v54 = vmul.f32 %v4846_v49, %v4841_v51  ;;  %v4842_v13 = vmul.f32 %v5863_v4, %v4826_v28 }
 0xc7a   : > { %v4853_v38 = vadd.f32 %v4852_v46, %v4847_v54  ;;  %v4848_v52 = vmul.f32 %v4846_v49, %v4842_v13 }
 0xc7c   : > { %4855 = vst.msk [vmem:[#allocation2] sm:$0xff] %vm868_vm5, %v4853_v38  ;;  %v4857_v11 = vcombine.high %v4853_v38, %v5907_v32  ;;  %v4854_v44 = vadd.f32 %v4852_v46, %v4848_v52  ;;  %v4864_v59 = vrot.slane %v4853_v38, %v6110_v0 }
 0xc7e   : > { %4856 = vst.msk [vmem:[#allocation2 + $0x8] sm:$0xff] %vm868_vm5, %v4854_v44  ;;  %v4872_v18 = vcombine.high %v4854_v44, %v5907_v32  ;;  %v4879_v60 = vrot.slane %v4854_v44, %v6110_v0  ;;  %v4871_v2 = vrot.slane %v4857_v11, %v6110_v0 }
 0xc80   : > { %v4886_v57 = vrot.slane %v4872_v18, %v6110_v0  ;;  %v4887_v63 = vcombine.low %v4864_v59, %v4879_v60  ;;  %v4888_v5 = vcombine.high %v4864_v59, %v4879_v60 }
 0xc82   : > { %v4895_v6 = vrot.slane %v4887_v63, %v6113_v7  ;;  %v4902_v1 = vrot.slane %v4888_v5, %v6113_v7  ;;  %v4903_v8 = vcombine.low %v4871_v2, %v4886_v57  ;;  %v4904_v9 = vcombine.high %v4871_v2, %v4886_v57 }
 0xc84   : > { %v4911_v14 = vrot.slane %v4903_v8, %v6113_v7  ;;  %v4918_v16 = vrot.slane %v4904_v9, %v6113_v7  ;;  %v4919_v17 = vcombine.high %v4895_v6, %v5907_v32  ;;  %v4920_v0 = vcombine.high %v4902_v1, %v5907_v32  ;;  %4924 = vst.msk [vmem:[#allocation3] sm:$0x3] %vm4923_vm10, %v4895_v6 }
 0xc85   : > { %4926 = vst.msk [vmem:[#allocation3 + $0x4] sm:$0x3] %vm4923_vm10, %v4902_v1 }
 0xc86   : > { %v4921_v20 = vcombine.high %v4911_v14, %v5907_v32  ;;  %v4922_v33 = vcombine.high %v4918_v16, %v5907_v32  ;;  %4925 = vst.msk [vmem:[#allocation3 + $0x2] sm:$0x3] %vm4923_vm10, %v4919_v17  ;;  %4927 = vst.msk [vmem:[#allocation3 + $0x6] sm:$0x3] %vm4923_vm10, %v4920_v0 }
 0xc87   : > { %4928 = vst.msk [vmem:[#allocation3 + $0x8] sm:$0x3] %vm4923_vm10, %v4911_v14  ;;  %4930 = vst.msk [vmem:[#allocation3 + $0xc] sm:$0x3] %vm4923_vm10, %v4918_v16 }
 0xc88   : > { %4929 = vst.msk [vmem:[#allocation3 + $0xa] sm:$0x3] %vm4923_vm10, %v4921_v20  ;;  %4931 = vst.msk [vmem:[#allocation3 + $0xe] sm:$0x3] %vm4923_vm10, %v4922_v33 }
 0xc89   : > { %5881 = shalt.err (!%p5878_p12)
}
 0xc8a   : > { %s5882_s11 = scalar_lea.hbm %s6827_s9, 256 }
 0xc8b   : > { %p5883_p13 = scmp.ne.s32.totalorder %s6827_s9, %s5882_s11  ;;  %p5888_p2 = scmp.lt.u32.totalorder %s5882_s11, %s6827_s9 }
 0xc8d   : > { %p5884_p0 = pnand %p5883_p13, %p5650_p5 }
 0xc8f   : > { %p5885_p1 = pneg %p5884_p0 }
 0xc91   : > { %p5890_p3 = pnand %p5888_p2, %p5885_p1 }
 0xc93   : > { %5893 = shalt.err (!%p5890_p3)
}
 0xc94   : > { %s5921_s27 = smov 32   ;;  %s5922_s16 = smov 2  }
 0xc95   : > { %5647 = dma.vmem_to_hbm [thread:$0]  (%p5650_p5), %s4939_s22, 256, %s6827_s9, [#allocation4], %s5921_s27, %s5921_s27, %s5922_s16  }
 0xc96   : > { %5899 = dma.done.wait (%p5650_p5), [#allocation4], 256  }
 0xc97   : > { %5901 = vsyncadd (%p5650_p5), [#allocation4], 4294967040 }
 0xc98 PF: > { %s20_s30 = sadd.s32 1, %s5904_s30  }
 0xc99   : > { %p17_p4 = scmp.ge.s32.totalorder %s20_s30, 4  }
 0xc9b   :  { %19 = sbr.rel (!%p17_p4) target bundleno = 1 (0x1), region = 102 }
 0xca2   :  { %4954 = vsyncpa [#allocation4], 1 }
 0xca3   :  { %4956 = vsyncpa [#allocation4 + $0x1], 1 }

</bundles_post_ra>
